<compile_context>
chip_gen: v6e
topology: v6e:2x2x1
jax: 0.10.0
libtpu: 0.0.40
codegen_flags: <defaults>
</compile_context>

<pallas_src>
import jax
import jax.numpy as jnp
from jax.experimental import pallas as pl
from jax.experimental.pallas import tpu as pltpu


# ----------------------------------------------------------------------------
# Fused Pallas kernel: all LSTM layers + FC in one invocation, no scratch refs
# ----------------------------------------------------------------------------
def _make_fused_kernel(num_layers, T, B, H):
    G = 4 * H

    def kernel(x_ref, *refs):
        # refs: [w_ih_t, w_hh_t, bias] * L, w_fc_t, b_fc, out
        w_refs = refs[: 3 * num_layers]
        wfc_ref = refs[3 * num_layers]          # (H, O) f32
        bfc_ref = refs[3 * num_layers + 1]      # (1, O) f32
        o_ref = refs[3 * num_layers + 2]        # (B, O) f32

        # Weights are VMEM-resident; load once into vregs.
        wih = [w_refs[3 * l][...] for l in range(num_layers)]       # bf16 (in, 4H), g-cols x2
        whh = [w_refs[3 * l + 1][...] for l in range(num_layers)]   # bf16 (H, 4H),  g-cols x2
        bias = [w_refs[3 * l + 2][...] for l in range(num_layers)]  # f32  (1, 4H),  g-cols x2

        # ---- Hoisted layer-0 input projection (off the recurrence path) -------
        # One (B*T, I) @ (I, 4H) MXU op + fused bias. Rows are batch-major
        # (row = b*T + t); the reshape below is layout-preserving (16 = 2*8
        # sublanes), so per-step reads are cheap static sublane slices.
        x_all = x_ref[...].astype(jnp.bfloat16)                      # (B*T, I)
        xw0 = jnp.dot(x_all, wih[0], preferred_element_type=jnp.float32) + bias[0]
        xw0 = xw0.reshape(B, T, G)                                   # [b, t, :]

        def cell(pre, h_prev_bf, c_prev, whh_l):
            gates = pre + jnp.dot(h_prev_bf, whh_l, preferred_element_type=jnp.float32)
            s = jax.nn.sigmoid(gates)            # ONE EUP pass over all 4 gates
            i_g = s[:, 0 * H:1 * H]
            f_g = s[:, 1 * H:2 * H]
            g_g = 2.0 * s[:, 2 * H:3 * H] - 1.0  # tanh(g) = 2*sigmoid(2g) - 1
            o_g = s[:, 3 * H:4 * H]
            c_new = f_g * c_prev + i_g * g_g
            h_new = o_g * jnp.tanh(c_new)
            return h_new, c_new

        h = [jnp.zeros((B, H), jnp.float32) for _ in range(num_layers)]
        c = [jnp.zeros((B, H), jnp.float32) for _ in range(num_layers)]
        h_bf = [jnp.zeros((B, H), jnp.bfloat16) for _ in range(num_layers)]

        # ---- Wavefront over (layer, time): diagonal d runs layer l at t = d - l.
        # Layers are visited high -> low within a diagonal so layer l reads layer
        # l-1's state from the PREVIOUS diagonal (== its time-t output), not the
        # freshly updated one.
        for d in range(T + num_layers - 1):
            for l in reversed(range(num_layers)):
                t = d - l
                if t < 0 or t >= T:
                    continue
                if l == 0:
                    pre = xw0[:, t, :]                               # (B, 4H)
                else:
                    # Per-step input projection keeps this layer's recurrence
                    # independent of the previous layer's later timesteps
                    # (this is what enables the wavefront overlap).
                    pre = (
                        jnp.dot(h_bf[l - 1], wih[l],
                                preferred_element_type=jnp.float32)
                        + bias[l]
                    )
                h_new, c_new = cell(pre, h_bf[l], c[l], whh[l])
                h[l] = h_new
                c[l] = c_new
                h_bf[l] = h_new.astype(jnp.bfloat16)

        # ---- Final Linear on h_{T-1} of the last layer (one-time, f32) --------
        out = (
            jnp.dot(h[num_layers - 1], wfc_ref[...],
                    preferred_element_type=jnp.float32)
            + bfc_ref[...]
        )
        o_ref[...] = out.astype(o_ref.dtype)

    return kernel


# ----------------------------------------------------------------------------
# One-time parameter preparation (outside the per-call path)
# ----------------------------------------------------------------------------
def prepare_kernel_params(params):
    """Transform PyTorch-style params into kernel-ready operands (done ONCE):
      * scale the g-gate columns [2H, 3H) of W_ih / W_hh / bias by 2 so the kernel
        recovers tanh(g) from a single full-width sigmoid (tanh(x)=2*sigmoid(2x)-1),
      * cast the matmul weights to bf16 (single-pass MXU), keep biases / FC in f32.
    """
    out = {"layers": []}
    for lp in params["layers"]:
        H = lp["w_hh_t"].shape[0]
        col_scale = jnp.concatenate(
            [jnp.ones((2 * H,), jnp.float32),
             jnp.full((H,), 2.0, jnp.float32),
             jnp.ones((H,), jnp.float32)]
        )
        out["layers"].append(
            {
                "w_ih_t": (lp["w_ih_t"] * col_scale).astype(jnp.bfloat16),
                "w_hh_t": (lp["w_hh_t"] * col_scale).astype(jnp.bfloat16),
                "bias": (lp["bias"] * col_scale).astype(jnp.float32),
            }
        )
    out["w_fc_t"] = params["w_fc_t"].astype(jnp.float32)
    out["b_fc"] = params["b_fc"].astype(jnp.float32)
    return out


# ----------------------------------------------------------------------------
# Wrapper
# ----------------------------------------------------------------------------
@jax.jit
def stock_lstm_forward(kparams, x_bti):
    """x_bti: (B, T, I) batch_first, as in the PyTorch module. Returns (B, O)."""
    B, T, I = x_bti.shape
    layers = kparams["layers"]
    num_layers = len(layers)
    H = layers[0]["w_hh_t"].shape[0]
    O = kparams["w_fc_t"].shape[1]

    # Free bitcast-reshape of the contiguous batch-first input (NO transpose op):
    # rows are batch-major (b*T + t); the kernel accounts for that ordering.
    x2d = x_bti.reshape(B * T, I).astype(jnp.float32)

    args = [x2d]
    for lp in layers:
        args += [lp["w_ih_t"], lp["w_hh_t"], lp["bias"]]
    args += [kparams["w_fc_t"], kparams["b_fc"]]

    vmem_spec = pl.BlockSpec(memory_space=pltpu.MemorySpace.VMEM)
    kernel = _make_fused_kernel(num_layers=num_layers, T=T, B=B, H=H)
    return pl.pallas_call(
        kernel,
        out_shape=jax.ShapeDtypeStruct((B, O), jnp.float32),
        in_specs=[vmem_spec] * len(args),
        out_specs=vmem_spec,
        compiler_params=pltpu.CompilerParams(vmem_limit_bytes=16 * 1024 * 1024),
    )(*args)


def init_params(key, input_size, hidden_size, num_layers, output_size):
    """Deterministic PyTorch-style init: U(-1/sqrt(H), 1/sqrt(H)). f32, unscaled."""
    k = 1.0 / jnp.sqrt(hidden_size)
    params = {"layers": []}
    for layer in range(num_layers):
        in_sz = input_size if layer == 0 else hidden_size
        key, k1, k2, k3, k4 = jax.random.split(key, 5)
        w_ih = jax.random.uniform(k1, (4 * hidden_size, in_sz), jnp.float32, -k, k)
        w_hh = jax.random.uniform(k2, (4 * hidden_size, hidden_size), jnp.float32, -k, k)
        b_ih = jax.random.uniform(k3, (4 * hidden_size,), jnp.float32, -k, k)
        b_hh = jax.random.uniform(k4, (4 * hidden_size,), jnp.float32, -k, k)
        params["layers"].append(
            {
                "w_ih_t": w_ih.T,                             # (in_sz, 4H)
                "w_hh_t": w_hh.T,                             # (H, 4H)
                "bias": (b_ih + b_hh).reshape(1, -1),         # (1, 4H)
            }
        )
    key, k5, k6 = jax.random.split(key, 3)
    kf = 1.0 / jnp.sqrt(hidden_size)
    w_fc = jax.random.uniform(k5, (output_size, hidden_size), jnp.float32, -kf, kf)
    b_fc = jax.random.uniform(k6, (output_size,), jnp.float32, -kf, kf)
    params["w_fc_t"] = w_fc.T                                 # (H, O)
    params["b_fc"] = b_fc.reshape(1, -1)                      # (1, O)
    return params


# ----------------------------------------------------------------------------
# Pure-JAX f32 reference (faithful eval-mode PyTorch semantics)
# ----------------------------------------------------------------------------
def stock_lstm_ref(params, x_bti):
    x = jnp.transpose(x_bti, (1, 0, 2)).astype(jnp.float32)   # (T, B, I)
    for layer in params["layers"]:
        T, B, _ = x.shape
        H = layer["w_hh_t"].shape[0]

        def step(carry, x_t):
            h, c = carry
            gates = x_t @ layer["w_ih_t"] + h @ layer["w_hh_t"] + layer["bias"]
            i = jax.nn.sigmoid(gates[:, 0 * H:1 * H])
            f = jax.nn.sigmoid(gates[:, 1 * H:2 * H])
            g = jnp.tanh(gates[:, 2 * H:3 * H])
            o = jax.nn.sigmoid(gates[:, 3 * H:4 * H])
            c = f * c + i * g
            h = o * jnp.tanh(c)
            return (h, c), h

        init = (jnp.zeros((B, H), jnp.float32), jnp.zeros((B, H), jnp.float32))
        _, ys = jax.lax.scan(step, init, x)
        x = ys
    return x[-1] @ params["w_fc_t"] + params["b_fc"]


# ----------------------------------------------------------------------------
if __name__ == "__main__":
    # Small shapes consistent with the module's forward: (batch, seq, input_size)
    batch, seq_len = 2, 8
    input_size, hidden_size, num_layers, output_size = 4, 32, 2, 1

    key = jax.random.PRNGKey(0)
    key, pkey, xkey = jax.random.split(key, 3)
    params = init_params(pkey, input_size, hidden_size, num_layers, output_size)
    kparams = prepare_kernel_params(params)   # one-time, outside the jitted forward
    x = jax.random.normal(xkey, (batch, seq_len, input_size), jnp.float32)

    out = stock_lstm_forward(kparams, x)
    out = jax.block_until_ready(out)

    ref = stock_lstm_ref(params, x)
    assert out.shape == (batch, output_size), out.shape
    # bf16 MXU operands in the kernel -> compare against the f32 reference with
    # a loosened tolerance (per review correctness note).
    assert jnp.allclose(out, ref, atol=2e-2, rtol=2e-2), (out, ref)

    print("KERNEL_OK")
</pallas_src>

<mosaic_0001>
module attributes {stable_mosaic.version = 11 : i64} {
  func.func @kernel(%arg0: memref<16x4xf32, #tpu.memory_space<vmem>>, %arg1: memref<4x128xbf16, #tpu.memory_space<vmem>>, %arg2: memref<32x128xbf16, #tpu.memory_space<vmem>>, %arg3: memref<1x128xf32, #tpu.memory_space<vmem>>, %arg4: memref<32x128xbf16, #tpu.memory_space<vmem>>, %arg5: memref<32x128xbf16, #tpu.memory_space<vmem>>, %arg6: memref<1x128xf32, #tpu.memory_space<vmem>>, %arg7: memref<32x1xf32, #tpu.memory_space<vmem>>, %arg8: memref<1x1xf32, #tpu.memory_space<vmem>>, %arg9: memref<2x1xf32, #tpu.memory_space<vmem>>) attributes {dimension_semantics = [], scalar_prefetch = 0 : i64, scratch_operands = 0 : i64, tpu.core_type = #tpu.core_type<tc>} {
    %c0 = arith.constant 0 : index
    %c0_0 = arith.constant 0 : index
    %0 = vector.load %arg1[%c0, %c0_0] : memref<4x128xbf16, #tpu.memory_space<vmem>>, vector<4x128xbf16>
    %c0_1 = arith.constant 0 : index
    %c0_2 = arith.constant 0 : index
    %1 = vector.load %arg4[%c0_1, %c0_2] : memref<32x128xbf16, #tpu.memory_space<vmem>>, vector<32x128xbf16>
    %c0_3 = arith.constant 0 : index
    %c0_4 = arith.constant 0 : index
    %2 = vector.load %arg2[%c0_3, %c0_4] : memref<32x128xbf16, #tpu.memory_space<vmem>>, vector<32x128xbf16>
    %c0_5 = arith.constant 0 : index
    %c0_6 = arith.constant 0 : index
    %3 = vector.load %arg5[%c0_5, %c0_6] : memref<32x128xbf16, #tpu.memory_space<vmem>>, vector<32x128xbf16>
    %c0_7 = arith.constant 0 : index
    %c0_8 = arith.constant 0 : index
    %4 = vector.load %arg3[%c0_7, %c0_8] : memref<1x128xf32, #tpu.memory_space<vmem>>, vector<1x128xf32>
    %c0_9 = arith.constant 0 : index
    %c0_10 = arith.constant 0 : index
    %5 = vector.load %arg6[%c0_9, %c0_10] : memref<1x128xf32, #tpu.memory_space<vmem>>, vector<1x128xf32>
    %c0_11 = arith.constant 0 : index
    %c0_12 = arith.constant 0 : index
    %6 = vector.load %arg0[%c0_11, %c0_12] : memref<16x4xf32, #tpu.memory_space<vmem>>, vector<16x4xf32>
    %7 = arith.truncf %6 : vector<16x4xf32> to vector<16x4xbf16>
    %cst = arith.constant dense<0.000000e+00> : vector<16x128xf32>
    %8 = tpu.matmul %7, %0, %cst {dimension_numbers = #tpu.dot_dimension_numbers<[1], [0], [0], [1], [0, 0, 1, 1], [], []>} : vector<16x4xbf16>, vector<4x128xbf16>, vector<16x128xf32> -> vector<16x128xf32>
    %9 = vector.broadcast %4 : vector<1x128xf32> to vector<16x128xf32>
    %10 = arith.addf %8, %9 : vector<16x128xf32>
    %11 = vector.shape_cast %10 : vector<16x128xf32> to vector<2x8x128xf32>
    %cst_13 = arith.constant 0.000000e+00 : f32
    %12 = vector.broadcast %cst_13 : f32 to vector<2x32xf32>
    %cst_14 = arith.constant 0.000000e+00 : f32
    %13 = vector.broadcast %cst_14 : f32 to vector<2x32xf32>
    %cst_15 = arith.constant 0.000000e+00 : bf16
    %14 = vector.broadcast %cst_15 : bf16 to vector<2x32xbf16>
    %cst_16 = arith.constant 0.000000e+00 : bf16
    %15 = vector.broadcast %cst_16 : bf16 to vector<2x32xbf16>
    %16 = vector.extract_strided_slice %11 {offsets = [0, 0, 0], sizes = [2, 1, 128], strides = [1, 1, 1]} : vector<2x8x128xf32> to vector<2x1x128xf32>
    %17 = vector.shape_cast %16 : vector<2x1x128xf32> to vector<2x128xf32>
    %cst_17 = arith.constant dense<0.000000e+00> : vector<2x128xf32>
    %18 = tpu.matmul %14, %2, %cst_17 {dimension_numbers = #tpu.dot_dimension_numbers<[1], [0], [0], [1], [0, 0, 1, 1], [], []>} : vector<2x32xbf16>, vector<32x128xbf16>, vector<2x128xf32> -> vector<2x128xf32>
    %19 = arith.addf %17, %18 : vector<2x128xf32>
    %20 = arith.negf %19 : vector<2x128xf32>
    %21 = math.exp %20 : vector<2x128xf32>
    %cst_18 = arith.constant 1.000000e+00 : f32
    %22 = vector.broadcast %cst_18 : f32 to vector<2x128xf32>
    %23 = arith.addf %22, %21 : vector<2x128xf32>
    %24 = arith.divf %22, %23 : vector<2x128xf32>
    %25 = vector.extract_strided_slice %24 {offsets = [0, 0], sizes = [2, 32], strides = [1, 1]} : vector<2x128xf32> to vector<2x32xf32>
    %26 = vector.extract_strided_slice %24 {offsets = [0, 32], sizes = [2, 32], strides = [1, 1]} : vector<2x128xf32> to vector<2x32xf32>
    %27 = vector.extract_strided_slice %24 {offsets = [0, 64], sizes = [2, 32], strides = [1, 1]} : vector<2x128xf32> to vector<2x32xf32>
    %cst_19 = arith.constant 2.000000e+00 : f32
    %28 = vector.broadcast %cst_19 : f32 to vector<2x32xf32>
    %29 = arith.mulf %28, %27 : vector<2x32xf32>
    %cst_20 = arith.constant 1.000000e+00 : f32
    %30 = vector.broadcast %cst_20 : f32 to vector<2x32xf32>
    %31 = arith.subf %29, %30 : vector<2x32xf32>
    %32 = vector.extract_strided_slice %24 {offsets = [0, 96], sizes = [2, 32], strides = [1, 1]} : vector<2x128xf32> to vector<2x32xf32>
    %33 = arith.mulf %26, %12 : vector<2x32xf32>
    %34 = arith.mulf %25, %31 : vector<2x32xf32>
    %35 = arith.addf %33, %34 : vector<2x32xf32>
    %36 = math.tanh %35 : vector<2x32xf32>
    %37 = arith.mulf %32, %36 : vector<2x32xf32>
    %38 = arith.truncf %37 : vector<2x32xf32> to vector<2x32xbf16>
    %cst_21 = arith.constant dense<0.000000e+00> : vector<2x128xf32>
    %39 = tpu.matmul %38, %1, %cst_21 {dimension_numbers = #tpu.dot_dimension_numbers<[1], [0], [0], [1], [0, 0, 1, 1], [], []>} : vector<2x32xbf16>, vector<32x128xbf16>, vector<2x128xf32> -> vector<2x128xf32>
    %40 = vector.broadcast %5 : vector<1x128xf32> to vector<2x128xf32>
    %41 = arith.addf %39, %40 : vector<2x128xf32>
    %cst_22 = arith.constant dense<0.000000e+00> : vector<2x128xf32>
    %42 = tpu.matmul %15, %3, %cst_22 {dimension_numbers = #tpu.dot_dimension_numbers<[1], [0], [0], [1], [0, 0, 1, 1], [], []>} : vector<2x32xbf16>, vector<32x128xbf16>, vector<2x128xf32> -> vector<2x128xf32>
    %43 = arith.addf %41, %42 : vector<2x128xf32>
    %44 = arith.negf %43 : vector<2x128xf32>
    %45 = math.exp %44 : vector<2x128xf32>
    %cst_23 = arith.constant 1.000000e+00 : f32
    %46 = vector.broadcast %cst_23 : f32 to vector<2x128xf32>
    %47 = arith.addf %46, %45 : vector<2x128xf32>
    %48 = arith.divf %46, %47 : vector<2x128xf32>
    %49 = vector.extract_strided_slice %48 {offsets = [0, 0], sizes = [2, 32], strides = [1, 1]} : vector<2x128xf32> to vector<2x32xf32>
    %50 = vector.extract_strided_slice %48 {offsets = [0, 32], sizes = [2, 32], strides = [1, 1]} : vector<2x128xf32> to vector<2x32xf32>
    %51 = vector.extract_strided_slice %48 {offsets = [0, 64], sizes = [2, 32], strides = [1, 1]} : vector<2x128xf32> to vector<2x32xf32>
    %cst_24 = arith.constant 2.000000e+00 : f32
    %52 = vector.broadcast %cst_24 : f32 to vector<2x32xf32>
    %53 = arith.mulf %52, %51 : vector<2x32xf32>
    %cst_25 = arith.constant 1.000000e+00 : f32
    %54 = vector.broadcast %cst_25 : f32 to vector<2x32xf32>
    %55 = arith.subf %53, %54 : vector<2x32xf32>
    %56 = vector.extract_strided_slice %48 {offsets = [0, 96], sizes = [2, 32], strides = [1, 1]} : vector<2x128xf32> to vector<2x32xf32>
    %57 = arith.mulf %50, %13 : vector<2x32xf32>
    %58 = arith.mulf %49, %55 : vector<2x32xf32>
    %59 = arith.addf %57, %58 : vector<2x32xf32>
    %60 = math.tanh %59 : vector<2x32xf32>
    %61 = arith.mulf %56, %60 : vector<2x32xf32>
    %62 = arith.truncf %61 : vector<2x32xf32> to vector<2x32xbf16>
    %63 = vector.extract_strided_slice %11 {offsets = [0, 1, 0], sizes = [2, 1, 128], strides = [1, 1, 1]} : vector<2x8x128xf32> to vector<2x1x128xf32>
    %64 = vector.shape_cast %63 : vector<2x1x128xf32> to vector<2x128xf32>
    %cst_26 = arith.constant dense<0.000000e+00> : vector<2x128xf32>
    %65 = tpu.matmul %38, %2, %cst_26 {dimension_numbers = #tpu.dot_dimension_numbers<[1], [0], [0], [1], [0, 0, 1, 1], [], []>} : vector<2x32xbf16>, vector<32x128xbf16>, vector<2x128xf32> -> vector<2x128xf32>
    %66 = arith.addf %64, %65 : vector<2x128xf32>
    %67 = arith.negf %66 : vector<2x128xf32>
    %68 = math.exp %67 : vector<2x128xf32>
    %cst_27 = arith.constant 1.000000e+00 : f32
    %69 = vector.broadcast %cst_27 : f32 to vector<2x128xf32>
    %70 = arith.addf %69, %68 : vector<2x128xf32>
    %71 = arith.divf %69, %70 : vector<2x128xf32>
    %72 = vector.extract_strided_slice %71 {offsets = [0, 0], sizes = [2, 32], strides = [1, 1]} : vector<2x128xf32> to vector<2x32xf32>
    %73 = vector.extract_strided_slice %71 {offsets = [0, 32], sizes = [2, 32], strides = [1, 1]} : vector<2x128xf32> to vector<2x32xf32>
    %74 = vector.extract_strided_slice %71 {offsets = [0, 64], sizes = [2, 32], strides = [1, 1]} : vector<2x128xf32> to vector<2x32xf32>
    %cst_28 = arith.constant 2.000000e+00 : f32
    %75 = vector.broadcast %cst_28 : f32 to vector<2x32xf32>
    %76 = arith.mulf %75, %74 : vector<2x32xf32>
    %cst_29 = arith.constant 1.000000e+00 : f32
    %77 = vector.broadcast %cst_29 : f32 to vector<2x32xf32>
    %78 = arith.subf %76, %77 : vector<2x32xf32>
    %79 = vector.extract_strided_slice %71 {offsets = [0, 96], sizes = [2, 32], strides = [1, 1]} : vector<2x128xf32> to vector<2x32xf32>
    %80 = arith.mulf %73, %35 : vector<2x32xf32>
    %81 = arith.mulf %72, %78 : vector<2x32xf32>
    %82 = arith.addf %80, %81 : vector<2x32xf32>
    %83 = math.tanh %82 : vector<2x32xf32>
    %84 = arith.mulf %79, %83 : vector<2x32xf32>
    %85 = arith.truncf %84 : vector<2x32xf32> to vector<2x32xbf16>
    %cst_30 = arith.constant dense<0.000000e+00> : vector<2x128xf32>
    %86 = tpu.matmul %85, %1, %cst_30 {dimension_numbers = #tpu.dot_dimension_numbers<[1], [0], [0], [1], [0, 0, 1, 1], [], []>} : vector<2x32xbf16>, vector<32x128xbf16>, vector<2x128xf32> -> vector<2x128xf32>
    %87 = vector.broadcast %5 : vector<1x128xf32> to vector<2x128xf32>
    %88 = arith.addf %86, %87 : vector<2x128xf32>
    %cst_31 = arith.constant dense<0.000000e+00> : vector<2x128xf32>
    %89 = tpu.matmul %62, %3, %cst_31 {dimension_numbers = #tpu.dot_dimension_numbers<[1], [0], [0], [1], [0, 0, 1, 1], [], []>} : vector<2x32xbf16>, vector<32x128xbf16>, vector<2x128xf32> -> vector<2x128xf32>
    %90 = arith.addf %88, %89 : vector<2x128xf32>
    %91 = arith.negf %90 : vector<2x128xf32>
    %92 = math.exp %91 : vector<2x128xf32>
    %cst_32 = arith.constant 1.000000e+00 : f32
    %93 = vector.broadcast %cst_32 : f32 to vector<2x128xf32>
    %94 = arith.addf %93, %92 : vector<2x128xf32>
    %95 = arith.divf %93, %94 : vector<2x128xf32>
    %96 = vector.extract_strided_slice %95 {offsets = [0, 0], sizes = [2, 32], strides = [1, 1]} : vector<2x128xf32> to vector<2x32xf32>
    %97 = vector.extract_strided_slice %95 {offsets = [0, 32], sizes = [2, 32], strides = [1, 1]} : vector<2x128xf32> to vector<2x32xf32>
    %98 = vector.extract_strided_slice %95 {offsets = [0, 64], sizes = [2, 32], strides = [1, 1]} : vector<2x128xf32> to vector<2x32xf32>
    %cst_33 = arith.constant 2.000000e+00 : f32
    %99 = vector.broadcast %cst_33 : f32 to vector<2x32xf32>
    %100 = arith.mulf %99, %98 : vector<2x32xf32>
    %cst_34 = arith.constant 1.000000e+00 : f32
    %101 = vector.broadcast %cst_34 : f32 to vector<2x32xf32>
    %102 = arith.subf %100, %101 : vector<2x32xf32>
    %103 = vector.extract_strided_slice %95 {offsets = [0, 96], sizes = [2, 32], strides = [1, 1]} : vector<2x128xf32> to vector<2x32xf32>
    %104 = arith.mulf %97, %59 : vector<2x32xf32>
    %105 = arith.mulf %96, %102 : vector<2x32xf32>
    %106 = arith.addf %104, %105 : vector<2x32xf32>
    %107 = math.tanh %106 : vector<2x32xf32>
    %108 = arith.mulf %103, %107 : vector<2x32xf32>
    %109 = arith.truncf %108 : vector<2x32xf32> to vector<2x32xbf16>
    %110 = vector.extract_strided_slice %11 {offsets = [0, 2, 0], sizes = [2, 1, 128], strides = [1, 1, 1]} : vector<2x8x128xf32> to vector<2x1x128xf32>
    %111 = vector.shape_cast %110 : vector<2x1x128xf32> to vector<2x128xf32>
    %cst_35 = arith.constant dense<0.000000e+00> : vector<2x128xf32>
    %112 = tpu.matmul %85, %2, %cst_35 {dimension_numbers = #tpu.dot_dimension_numbers<[1], [0], [0], [1], [0, 0, 1, 1], [], []>} : vector<2x32xbf16>, vector<32x128xbf16>, vector<2x128xf32> -> vector<2x128xf32>
    %113 = arith.addf %111, %112 : vector<2x128xf32>
    %114 = arith.negf %113 : vector<2x128xf32>
    %115 = math.exp %114 : vector<2x128xf32>
    %cst_36 = arith.constant 1.000000e+00 : f32
    %116 = vector.broadcast %cst_36 : f32 to vector<2x128xf32>
    %117 = arith.addf %116, %115 : vector<2x128xf32>
    %118 = arith.divf %116, %117 : vector<2x128xf32>
    %119 = vector.extract_strided_slice %118 {offsets = [0, 0], sizes = [2, 32], strides = [1, 1]} : vector<2x128xf32> to vector<2x32xf32>
    %120 = vector.extract_strided_slice %118 {offsets = [0, 32], sizes = [2, 32], strides = [1, 1]} : vector<2x128xf32> to vector<2x32xf32>
    %121 = vector.extract_strided_slice %118 {offsets = [0, 64], sizes = [2, 32], strides = [1, 1]} : vector<2x128xf32> to vector<2x32xf32>
    %cst_37 = arith.constant 2.000000e+00 : f32
    %122 = vector.broadcast %cst_37 : f32 to vector<2x32xf32>
    %123 = arith.mulf %122, %121 : vector<2x32xf32>
    %cst_38 = arith.constant 1.000000e+00 : f32
    %124 = vector.broadcast %cst_38 : f32 to vector<2x32xf32>
    %125 = arith.subf %123, %124 : vector<2x32xf32>
    %126 = vector.extract_strided_slice %118 {offsets = [0, 96], sizes = [2, 32], strides = [1, 1]} : vector<2x128xf32> to vector<2x32xf32>
    %127 = arith.mulf %120, %82 : vector<2x32xf32>
    %128 = arith.mulf %119, %125 : vector<2x32xf32>
    %129 = arith.addf %127, %128 : vector<2x32xf32>
    %130 = math.tanh %129 : vector<2x32xf32>
    %131 = arith.mulf %126, %130 : vector<2x32xf32>
    %132 = arith.truncf %131 : vector<2x32xf32> to vector<2x32xbf16>
    %cst_39 = arith.constant dense<0.000000e+00> : vector<2x128xf32>
    %133 = tpu.matmul %132, %1, %cst_39 {dimension_numbers = #tpu.dot_dimension_numbers<[1], [0], [0], [1], [0, 0, 1, 1], [], []>} : vector<2x32xbf16>, vector<32x128xbf16>, vector<2x128xf32> -> vector<2x128xf32>
    %134 = vector.broadcast %5 : vector<1x128xf32> to vector<2x128xf32>
    %135 = arith.addf %133, %134 : vector<2x128xf32>
    %cst_40 = arith.constant dense<0.000000e+00> : vector<2x128xf32>
    %136 = tpu.matmul %109, %3, %cst_40 {dimension_numbers = #tpu.dot_dimension_numbers<[1], [0], [0], [1], [0, 0, 1, 1], [], []>} : vector<2x32xbf16>, vector<32x128xbf16>, vector<2x128xf32> -> vector<2x128xf32>
    %137 = arith.addf %135, %136 : vector<2x128xf32>
    %138 = arith.negf %137 : vector<2x128xf32>
    %139 = math.exp %138 : vector<2x128xf32>
    %cst_41 = arith.constant 1.000000e+00 : f32
    %140 = vector.broadcast %cst_41 : f32 to vector<2x128xf32>
    %141 = arith.addf %140, %139 : vector<2x128xf32>
    %142 = arith.divf %140, %141 : vector<2x128xf32>
    %143 = vector.extract_strided_slice %142 {offsets = [0, 0], sizes = [2, 32], strides = [1, 1]} : vector<2x128xf32> to vector<2x32xf32>
    %144 = vector.extract_strided_slice %142 {offsets = [0, 32], sizes = [2, 32], strides = [1, 1]} : vector<2x128xf32> to vector<2x32xf32>
    %145 = vector.extract_strided_slice %142 {offsets = [0, 64], sizes = [2, 32], strides = [1, 1]} : vector<2x128xf32> to vector<2x32xf32>
    %cst_42 = arith.constant 2.000000e+00 : f32
    %146 = vector.broadcast %cst_42 : f32 to vector<2x32xf32>
    %147 = arith.mulf %146, %145 : vector<2x32xf32>
    %cst_43 = arith.constant 1.000000e+00 : f32
    %148 = vector.broadcast %cst_43 : f32 to vector<2x32xf32>
    %149 = arith.subf %147, %148 : vector<2x32xf32>
    %150 = vector.extract_strided_slice %142 {offsets = [0, 96], sizes = [2, 32], strides = [1, 1]} : vector<2x128xf32> to vector<2x32xf32>
    %151 = arith.mulf %144, %106 : vector<2x32xf32>
    %152 = arith.mulf %143, %149 : vector<2x32xf32>
    %153 = arith.addf %151, %152 : vector<2x32xf32>
    %154 = math.tanh %153 : vector<2x32xf32>
    %155 = arith.mulf %150, %154 : vector<2x32xf32>
    %156 = arith.truncf %155 : vector<2x32xf32> to vector<2x32xbf16>
    %157 = vector.extract_strided_slice %11 {offsets = [0, 3, 0], sizes = [2, 1, 128], strides = [1, 1, 1]} : vector<2x8x128xf32> to vector<2x1x128xf32>
    %158 = vector.shape_cast %157 : vector<2x1x128xf32> to vector<2x128xf32>
    %cst_44 = arith.constant dense<0.000000e+00> : vector<2x128xf32>
    %159 = tpu.matmul %132, %2, %cst_44 {dimension_numbers = #tpu.dot_dimension_numbers<[1], [0], [0], [1], [0, 0, 1, 1], [], []>} : vector<2x32xbf16>, vector<32x128xbf16>, vector<2x128xf32> -> vector<2x128xf32>
    %160 = arith.addf %158, %159 : vector<2x128xf32>
    %161 = arith.negf %160 : vector<2x128xf32>
    %162 = math.exp %161 : vector<2x128xf32>
    %cst_45 = arith.constant 1.000000e+00 : f32
    %163 = vector.broadcast %cst_45 : f32 to vector<2x128xf32>
    %164 = arith.addf %163, %162 : vector<2x128xf32>
    %165 = arith.divf %163, %164 : vector<2x128xf32>
    %166 = vector.extract_strided_slice %165 {offsets = [0, 0], sizes = [2, 32], strides = [1, 1]} : vector<2x128xf32> to vector<2x32xf32>
    %167 = vector.extract_strided_slice %165 {offsets = [0, 32], sizes = [2, 32], strides = [1, 1]} : vector<2x128xf32> to vector<2x32xf32>
    %168 = vector.extract_strided_slice %165 {offsets = [0, 64], sizes = [2, 32], strides = [1, 1]} : vector<2x128xf32> to vector<2x32xf32>
    %cst_46 = arith.constant 2.000000e+00 : f32
    %169 = vector.broadcast %cst_46 : f32 to vector<2x32xf32>
    %170 = arith.mulf %169, %168 : vector<2x32xf32>
    %cst_47 = arith.constant 1.000000e+00 : f32
    %171 = vector.broadcast %cst_47 : f32 to vector<2x32xf32>
    %172 = arith.subf %170, %171 : vector<2x32xf32>
    %173 = vector.extract_strided_slice %165 {offsets = [0, 96], sizes = [2, 32], strides = [1, 1]} : vector<2x128xf32> to vector<2x32xf32>
    %174 = arith.mulf %167, %129 : vector<2x32xf32>
    %175 = arith.mulf %166, %172 : vector<2x32xf32>
    %176 = arith.addf %174, %175 : vector<2x32xf32>
    %177 = math.tanh %176 : vector<2x32xf32>
    %178 = arith.mulf %173, %177 : vector<2x32xf32>
    %179 = arith.truncf %178 : vector<2x32xf32> to vector<2x32xbf16>
    %cst_48 = arith.constant dense<0.000000e+00> : vector<2x128xf32>
    %180 = tpu.matmul %179, %1, %cst_48 {dimension_numbers = #tpu.dot_dimension_numbers<[1], [0], [0], [1], [0, 0, 1, 1], [], []>} : vector<2x32xbf16>, vector<32x128xbf16>, vector<2x128xf32> -> vector<2x128xf32>
    %181 = vector.broadcast %5 : vector<1x128xf32> to vector<2x128xf32>
    %182 = arith.addf %180, %181 : vector<2x128xf32>
    %cst_49 = arith.constant dense<0.000000e+00> : vector<2x128xf32>
    %183 = tpu.matmul %156, %3, %cst_49 {dimension_numbers = #tpu.dot_dimension_numbers<[1], [0], [0], [1], [0, 0, 1, 1], [], []>} : vector<2x32xbf16>, vector<32x128xbf16>, vector<2x128xf32> -> vector<2x128xf32>
    %184 = arith.addf %182, %183 : vector<2x128xf32>
    %185 = arith.negf %184 : vector<2x128xf32>
    %186 = math.exp %185 : vector<2x128xf32>
    %cst_50 = arith.constant 1.000000e+00 : f32
    %187 = vector.broadcast %cst_50 : f32 to vector<2x128xf32>
    %188 = arith.addf %187, %186 : vector<2x128xf32>
    %189 = arith.divf %187, %188 : vector<2x128xf32>
    %190 = vector.extract_strided_slice %189 {offsets = [0, 0], sizes = [2, 32], strides = [1, 1]} : vector<2x128xf32> to vector<2x32xf32>
    %191 = vector.extract_strided_slice %189 {offsets = [0, 32], sizes = [2, 32], strides = [1, 1]} : vector<2x128xf32> to vector<2x32xf32>
    %192 = vector.extract_strided_slice %189 {offsets = [0, 64], sizes = [2, 32], strides = [1, 1]} : vector<2x128xf32> to vector<2x32xf32>
    %cst_51 = arith.constant 2.000000e+00 : f32
    %193 = vector.broadcast %cst_51 : f32 to vector<2x32xf32>
    %194 = arith.mulf %193, %192 : vector<2x32xf32>
    %cst_52 = arith.constant 1.000000e+00 : f32
    %195 = vector.broadcast %cst_52 : f32 to vector<2x32xf32>
    %196 = arith.subf %194, %195 : vector<2x32xf32>
    %197 = vector.extract_strided_slice %189 {offsets = [0, 96], sizes = [2, 32], strides = [1, 1]} : vector<2x128xf32> to vector<2x32xf32>
    %198 = arith.mulf %191, %153 : vector<2x32xf32>
    %199 = arith.mulf %190, %196 : vector<2x32xf32>
    %200 = arith.addf %198, %199 : vector<2x32xf32>
    %201 = math.tanh %200 : vector<2x32xf32>
    %202 = arith.mulf %197, %201 : vector<2x32xf32>
    %203 = arith.truncf %202 : vector<2x32xf32> to vector<2x32xbf16>
    %204 = vector.extract_strided_slice %11 {offsets = [0, 4, 0], sizes = [2, 1, 128], strides = [1, 1, 1]} : vector<2x8x128xf32> to vector<2x1x128xf32>
    %205 = vector.shape_cast %204 : vector<2x1x128xf32> to vector<2x128xf32>
    %cst_53 = arith.constant dense<0.000000e+00> : vector<2x128xf32>
    %206 = tpu.matmul %179, %2, %cst_53 {dimension_numbers = #tpu.dot_dimension_numbers<[1], [0], [0], [1], [0, 0, 1, 1], [], []>} : vector<2x32xbf16>, vector<32x128xbf16>, vector<2x128xf32> -> vector<2x128xf32>
    %207 = arith.addf %205, %206 : vector<2x128xf32>
    %208 = arith.negf %207 : vector<2x128xf32>
    %209 = math.exp %208 : vector<2x128xf32>
    %cst_54 = arith.constant 1.000000e+00 : f32
    %210 = vector.broadcast %cst_54 : f32 to vector<2x128xf32>
    %211 = arith.addf %210, %209 : vector<2x128xf32>
    %212 = arith.divf %210, %211 : vector<2x128xf32>
    %213 = vector.extract_strided_slice %212 {offsets = [0, 0], sizes = [2, 32], strides = [1, 1]} : vector<2x128xf32> to vector<2x32xf32>
    %214 = vector.extract_strided_slice %212 {offsets = [0, 32], sizes = [2, 32], strides = [1, 1]} : vector<2x128xf32> to vector<2x32xf32>
    %215 = vector.extract_strided_slice %212 {offsets = [0, 64], sizes = [2, 32], strides = [1, 1]} : vector<2x128xf32> to vector<2x32xf32>
    %cst_55 = arith.constant 2.000000e+00 : f32
    %216 = vector.broadcast %cst_55 : f32 to vector<2x32xf32>
    %217 = arith.mulf %216, %215 : vector<2x32xf32>
    %cst_56 = arith.constant 1.000000e+00 : f32
    %218 = vector.broadcast %cst_56 : f32 to vector<2x32xf32>
    %219 = arith.subf %217, %218 : vector<2x32xf32>
    %220 = vector.extract_strided_slice %212 {offsets = [0, 96], sizes = [2, 32], strides = [1, 1]} : vector<2x128xf32> to vector<2x32xf32>
    %221 = arith.mulf %214, %176 : vector<2x32xf32>
    %222 = arith.mulf %213, %219 : vector<2x32xf32>
    %223 = arith.addf %221, %222 : vector<2x32xf32>
    %224 = math.tanh %223 : vector<2x32xf32>
    %225 = arith.mulf %220, %224 : vector<2x32xf32>
    %226 = arith.truncf %225 : vector<2x32xf32> to vector<2x32xbf16>
    %cst_57 = arith.constant dense<0.000000e+00> : vector<2x128xf32>
    %227 = tpu.matmul %226, %1, %cst_57 {dimension_numbers = #tpu.dot_dimension_numbers<[1], [0], [0], [1], [0, 0, 1, 1], [], []>} : vector<2x32xbf16>, vector<32x128xbf16>, vector<2x128xf32> -> vector<2x128xf32>
    %228 = vector.broadcast %5 : vector<1x128xf32> to vector<2x128xf32>
    %229 = arith.addf %227, %228 : vector<2x128xf32>
    %cst_58 = arith.constant dense<0.000000e+00> : vector<2x128xf32>
    %230 = tpu.matmul %203, %3, %cst_58 {dimension_numbers = #tpu.dot_dimension_numbers<[1], [0], [0], [1], [0, 0, 1, 1], [], []>} : vector<2x32xbf16>, vector<32x128xbf16>, vector<2x128xf32> -> vector<2x128xf32>
    %231 = arith.addf %229, %230 : vector<2x128xf32>
    %232 = arith.negf %231 : vector<2x128xf32>
    %233 = math.exp %232 : vector<2x128xf32>
    %cst_59 = arith.constant 1.000000e+00 : f32
    %234 = vector.broadcast %cst_59 : f32 to vector<2x128xf32>
    %235 = arith.addf %234, %233 : vector<2x128xf32>
    %236 = arith.divf %234, %235 : vector<2x128xf32>
    %237 = vector.extract_strided_slice %236 {offsets = [0, 0], sizes = [2, 32], strides = [1, 1]} : vector<2x128xf32> to vector<2x32xf32>
    %238 = vector.extract_strided_slice %236 {offsets = [0, 32], sizes = [2, 32], strides = [1, 1]} : vector<2x128xf32> to vector<2x32xf32>
    %239 = vector.extract_strided_slice %236 {offsets = [0, 64], sizes = [2, 32], strides = [1, 1]} : vector<2x128xf32> to vector<2x32xf32>
    %cst_60 = arith.constant 2.000000e+00 : f32
    %240 = vector.broadcast %cst_60 : f32 to vector<2x32xf32>
    %241 = arith.mulf %240, %239 : vector<2x32xf32>
    %cst_61 = arith.constant 1.000000e+00 : f32
    %242 = vector.broadcast %cst_61 : f32 to vector<2x32xf32>
    %243 = arith.subf %241, %242 : vector<2x32xf32>
    %244 = vector.extract_strided_slice %236 {offsets = [0, 96], sizes = [2, 32], strides = [1, 1]} : vector<2x128xf32> to vector<2x32xf32>
    %245 = arith.mulf %238, %200 : vector<2x32xf32>
    %246 = arith.mulf %237, %243 : vector<2x32xf32>
    %247 = arith.addf %245, %246 : vector<2x32xf32>
    %248 = math.tanh %247 : vector<2x32xf32>
    %249 = arith.mulf %244, %248 : vector<2x32xf32>
    %250 = arith.truncf %249 : vector<2x32xf32> to vector<2x32xbf16>
    %251 = vector.extract_strided_slice %11 {offsets = [0, 5, 0], sizes = [2, 1, 128], strides = [1, 1, 1]} : vector<2x8x128xf32> to vector<2x1x128xf32>
    %252 = vector.shape_cast %251 : vector<2x1x128xf32> to vector<2x128xf32>
    %cst_62 = arith.constant dense<0.000000e+00> : vector<2x128xf32>
    %253 = tpu.matmul %226, %2, %cst_62 {dimension_numbers = #tpu.dot_dimension_numbers<[1], [0], [0], [1], [0, 0, 1, 1], [], []>} : vector<2x32xbf16>, vector<32x128xbf16>, vector<2x128xf32> -> vector<2x128xf32>
    %254 = arith.addf %252, %253 : vector<2x128xf32>
    %255 = arith.negf %254 : vector<2x128xf32>
    %256 = math.exp %255 : vector<2x128xf32>
    %cst_63 = arith.constant 1.000000e+00 : f32
    %257 = vector.broadcast %cst_63 : f32 to vector<2x128xf32>
    %258 = arith.addf %257, %256 : vector<2x128xf32>
    %259 = arith.divf %257, %258 : vector<2x128xf32>
    %260 = vector.extract_strided_slice %259 {offsets = [0, 0], sizes = [2, 32], strides = [1, 1]} : vector<2x128xf32> to vector<2x32xf32>
    %261 = vector.extract_strided_slice %259 {offsets = [0, 32], sizes = [2, 32], strides = [1, 1]} : vector<2x128xf32> to vector<2x32xf32>
    %262 = vector.extract_strided_slice %259 {offsets = [0, 64], sizes = [2, 32], strides = [1, 1]} : vector<2x128xf32> to vector<2x32xf32>
    %cst_64 = arith.constant 2.000000e+00 : f32
    %263 = vector.broadcast %cst_64 : f32 to vector<2x32xf32>
    %264 = arith.mulf %263, %262 : vector<2x32xf32>
    %cst_65 = arith.constant 1.000000e+00 : f32
    %265 = vector.broadcast %cst_65 : f32 to vector<2x32xf32>
    %266 = arith.subf %264, %265 : vector<2x32xf32>
    %267 = vector.extract_strided_slice %259 {offsets = [0, 96], sizes = [2, 32], strides = [1, 1]} : vector<2x128xf32> to vector<2x32xf32>
    %268 = arith.mulf %261, %223 : vector<2x32xf32>
    %269 = arith.mulf %260, %266 : vector<2x32xf32>
    %270 = arith.addf %268, %269 : vector<2x32xf32>
    %271 = math.tanh %270 : vector<2x32xf32>
    %272 = arith.mulf %267, %271 : vector<2x32xf32>
    %273 = arith.truncf %272 : vector<2x32xf32> to vector<2x32xbf16>
    %cst_66 = arith.constant dense<0.000000e+00> : vector<2x128xf32>
    %274 = tpu.matmul %273, %1, %cst_66 {dimension_numbers = #tpu.dot_dimension_numbers<[1], [0], [0], [1], [0, 0, 1, 1], [], []>} : vector<2x32xbf16>, vector<32x128xbf16>, vector<2x128xf32> -> vector<2x128xf32>
    %275 = vector.broadcast %5 : vector<1x128xf32> to vector<2x128xf32>
    %276 = arith.addf %274, %275 : vector<2x128xf32>
    %cst_67 = arith.constant dense<0.000000e+00> : vector<2x128xf32>
    %277 = tpu.matmul %250, %3, %cst_67 {dimension_numbers = #tpu.dot_dimension_numbers<[1], [0], [0], [1], [0, 0, 1, 1], [], []>} : vector<2x32xbf16>, vector<32x128xbf16>, vector<2x128xf32> -> vector<2x128xf32>
    %278 = arith.addf %276, %277 : vector<2x128xf32>
    %279 = arith.negf %278 : vector<2x128xf32>
    %280 = math.exp %279 : vector<2x128xf32>
    %cst_68 = arith.constant 1.000000e+00 : f32
    %281 = vector.broadcast %cst_68 : f32 to vector<2x128xf32>
    %282 = arith.addf %281, %280 : vector<2x128xf32>
    %283 = arith.divf %281, %282 : vector<2x128xf32>
    %284 = vector.extract_strided_slice %283 {offsets = [0, 0], sizes = [2, 32], strides = [1, 1]} : vector<2x128xf32> to vector<2x32xf32>
    %285 = vector.extract_strided_slice %283 {offsets = [0, 32], sizes = [2, 32], strides = [1, 1]} : vector<2x128xf32> to vector<2x32xf32>
    %286 = vector.extract_strided_slice %283 {offsets = [0, 64], sizes = [2, 32], strides = [1, 1]} : vector<2x128xf32> to vector<2x32xf32>
    %cst_69 = arith.constant 2.000000e+00 : f32
    %287 = vector.broadcast %cst_69 : f32 to vector<2x32xf32>
    %288 = arith.mulf %287, %286 : vector<2x32xf32>
    %cst_70 = arith.constant 1.000000e+00 : f32
    %289 = vector.broadcast %cst_70 : f32 to vector<2x32xf32>
    %290 = arith.subf %288, %289 : vector<2x32xf32>
    %291 = vector.extract_strided_slice %283 {offsets = [0, 96], sizes = [2, 32], strides = [1, 1]} : vector<2x128xf32> to vector<2x32xf32>
    %292 = arith.mulf %285, %247 : vector<2x32xf32>
    %293 = arith.mulf %284, %290 : vector<2x32xf32>
    %294 = arith.addf %292, %293 : vector<2x32xf32>
    %295 = math.tanh %294 : vector<2x32xf32>
    %296 = arith.mulf %291, %295 : vector<2x32xf32>
    %297 = arith.truncf %296 : vector<2x32xf32> to vector<2x32xbf16>
    %298 = vector.extract_strided_slice %11 {offsets = [0, 6, 0], sizes = [2, 1, 128], strides = [1, 1, 1]} : vector<2x8x128xf32> to vector<2x1x128xf32>
    %299 = vector.shape_cast %298 : vector<2x1x128xf32> to vector<2x128xf32>
    %cst_71 = arith.constant dense<0.000000e+00> : vector<2x128xf32>
    %300 = tpu.matmul %273, %2, %cst_71 {dimension_numbers = #tpu.dot_dimension_numbers<[1], [0], [0], [1], [0, 0, 1, 1], [], []>} : vector<2x32xbf16>, vector<32x128xbf16>, vector<2x128xf32> -> vector<2x128xf32>
    %301 = arith.addf %299, %300 : vector<2x128xf32>
    %302 = arith.negf %301 : vector<2x128xf32>
    %303 = math.exp %302 : vector<2x128xf32>
    %cst_72 = arith.constant 1.000000e+00 : f32
    %304 = vector.broadcast %cst_72 : f32 to vector<2x128xf32>
    %305 = arith.addf %304, %303 : vector<2x128xf32>
    %306 = arith.divf %304, %305 : vector<2x128xf32>
    %307 = vector.extract_strided_slice %306 {offsets = [0, 0], sizes = [2, 32], strides = [1, 1]} : vector<2x128xf32> to vector<2x32xf32>
    %308 = vector.extract_strided_slice %306 {offsets = [0, 32], sizes = [2, 32], strides = [1, 1]} : vector<2x128xf32> to vector<2x32xf32>
    %309 = vector.extract_strided_slice %306 {offsets = [0, 64], sizes = [2, 32], strides = [1, 1]} : vector<2x128xf32> to vector<2x32xf32>
    %cst_73 = arith.constant 2.000000e+00 : f32
    %310 = vector.broadcast %cst_73 : f32 to vector<2x32xf32>
    %311 = arith.mulf %310, %309 : vector<2x32xf32>
    %cst_74 = arith.constant 1.000000e+00 : f32
    %312 = vector.broadcast %cst_74 : f32 to vector<2x32xf32>
    %313 = arith.subf %311, %312 : vector<2x32xf32>
    %314 = vector.extract_strided_slice %306 {offsets = [0, 96], sizes = [2, 32], strides = [1, 1]} : vector<2x128xf32> to vector<2x32xf32>
    %315 = arith.mulf %308, %270 : vector<2x32xf32>
    %316 = arith.mulf %307, %313 : vector<2x32xf32>
    %317 = arith.addf %315, %316 : vector<2x32xf32>
    %318 = math.tanh %317 : vector<2x32xf32>
    %319 = arith.mulf %314, %318 : vector<2x32xf32>
    %320 = arith.truncf %319 : vector<2x32xf32> to vector<2x32xbf16>
    %cst_75 = arith.constant dense<0.000000e+00> : vector<2x128xf32>
    %321 = tpu.matmul %320, %1, %cst_75 {dimension_numbers = #tpu.dot_dimension_numbers<[1], [0], [0], [1], [0, 0, 1, 1], [], []>} : vector<2x32xbf16>, vector<32x128xbf16>, vector<2x128xf32> -> vector<2x128xf32>
    %322 = vector.broadcast %5 : vector<1x128xf32> to vector<2x128xf32>
    %323 = arith.addf %321, %322 : vector<2x128xf32>
    %cst_76 = arith.constant dense<0.000000e+00> : vector<2x128xf32>
    %324 = tpu.matmul %297, %3, %cst_76 {dimension_numbers = #tpu.dot_dimension_numbers<[1], [0], [0], [1], [0, 0, 1, 1], [], []>} : vector<2x32xbf16>, vector<32x128xbf16>, vector<2x128xf32> -> vector<2x128xf32>
    %325 = arith.addf %323, %324 : vector<2x128xf32>
    %326 = arith.negf %325 : vector<2x128xf32>
    %327 = math.exp %326 : vector<2x128xf32>
    %cst_77 = arith.constant 1.000000e+00 : f32
    %328 = vector.broadcast %cst_77 : f32 to vector<2x128xf32>
    %329 = arith.addf %328, %327 : vector<2x128xf32>
    %330 = arith.divf %328, %329 : vector<2x128xf32>
    %331 = vector.extract_strided_slice %330 {offsets = [0, 0], sizes = [2, 32], strides = [1, 1]} : vector<2x128xf32> to vector<2x32xf32>
    %332 = vector.extract_strided_slice %330 {offsets = [0, 32], sizes = [2, 32], strides = [1, 1]} : vector<2x128xf32> to vector<2x32xf32>
    %333 = vector.extract_strided_slice %330 {offsets = [0, 64], sizes = [2, 32], strides = [1, 1]} : vector<2x128xf32> to vector<2x32xf32>
    %cst_78 = arith.constant 2.000000e+00 : f32
    %334 = vector.broadcast %cst_78 : f32 to vector<2x32xf32>
    %335 = arith.mulf %334, %333 : vector<2x32xf32>
    %cst_79 = arith.constant 1.000000e+00 : f32
    %336 = vector.broadcast %cst_79 : f32 to vector<2x32xf32>
    %337 = arith.subf %335, %336 : vector<2x32xf32>
    %338 = vector.extract_strided_slice %330 {offsets = [0, 96], sizes = [2, 32], strides = [1, 1]} : vector<2x128xf32> to vector<2x32xf32>
    %339 = arith.mulf %332, %294 : vector<2x32xf32>
    %340 = arith.mulf %331, %337 : vector<2x32xf32>
    %341 = arith.addf %339, %340 : vector<2x32xf32>
    %342 = math.tanh %341 : vector<2x32xf32>
    %343 = arith.mulf %338, %342 : vector<2x32xf32>
    %344 = arith.truncf %343 : vector<2x32xf32> to vector<2x32xbf16>
    %345 = vector.extract_strided_slice %11 {offsets = [0, 7, 0], sizes = [2, 1, 128], strides = [1, 1, 1]} : vector<2x8x128xf32> to vector<2x1x128xf32>
    %346 = vector.shape_cast %345 : vector<2x1x128xf32> to vector<2x128xf32>
    %cst_80 = arith.constant dense<0.000000e+00> : vector<2x128xf32>
    %347 = tpu.matmul %320, %2, %cst_80 {dimension_numbers = #tpu.dot_dimension_numbers<[1], [0], [0], [1], [0, 0, 1, 1], [], []>} : vector<2x32xbf16>, vector<32x128xbf16>, vector<2x128xf32> -> vector<2x128xf32>
    %348 = arith.addf %346, %347 : vector<2x128xf32>
    %349 = arith.negf %348 : vector<2x128xf32>
    %350 = math.exp %349 : vector<2x128xf32>
    %cst_81 = arith.constant 1.000000e+00 : f32
    %351 = vector.broadcast %cst_81 : f32 to vector<2x128xf32>
    %352 = arith.addf %351, %350 : vector<2x128xf32>
    %353 = arith.divf %351, %352 : vector<2x128xf32>
    %354 = vector.extract_strided_slice %353 {offsets = [0, 0], sizes = [2, 32], strides = [1, 1]} : vector<2x128xf32> to vector<2x32xf32>
    %355 = vector.extract_strided_slice %353 {offsets = [0, 32], sizes = [2, 32], strides = [1, 1]} : vector<2x128xf32> to vector<2x32xf32>
    %356 = vector.extract_strided_slice %353 {offsets = [0, 64], sizes = [2, 32], strides = [1, 1]} : vector<2x128xf32> to vector<2x32xf32>
    %cst_82 = arith.constant 2.000000e+00 : f32
    %357 = vector.broadcast %cst_82 : f32 to vector<2x32xf32>
    %358 = arith.mulf %357, %356 : vector<2x32xf32>
    %cst_83 = arith.constant 1.000000e+00 : f32
    %359 = vector.broadcast %cst_83 : f32 to vector<2x32xf32>
    %360 = arith.subf %358, %359 : vector<2x32xf32>
    %361 = vector.extract_strided_slice %353 {offsets = [0, 96], sizes = [2, 32], strides = [1, 1]} : vector<2x128xf32> to vector<2x32xf32>
    %362 = arith.mulf %355, %317 : vector<2x32xf32>
    %363 = arith.mulf %354, %360 : vector<2x32xf32>
    %364 = arith.addf %362, %363 : vector<2x32xf32>
    %365 = math.tanh %364 : vector<2x32xf32>
    %366 = arith.mulf %361, %365 : vector<2x32xf32>
    %367 = arith.truncf %366 : vector<2x32xf32> to vector<2x32xbf16>
    %cst_84 = arith.constant dense<0.000000e+00> : vector<2x128xf32>
    %368 = tpu.matmul %367, %1, %cst_84 {dimension_numbers = #tpu.dot_dimension_numbers<[1], [0], [0], [1], [0, 0, 1, 1], [], []>} : vector<2x32xbf16>, vector<32x128xbf16>, vector<2x128xf32> -> vector<2x128xf32>
    %369 = vector.broadcast %5 : vector<1x128xf32> to vector<2x128xf32>
    %370 = arith.addf %368, %369 : vector<2x128xf32>
    %cst_85 = arith.constant dense<0.000000e+00> : vector<2x128xf32>
    %371 = tpu.matmul %344, %3, %cst_85 {dimension_numbers = #tpu.dot_dimension_numbers<[1], [0], [0], [1], [0, 0, 1, 1], [], []>} : vector<2x32xbf16>, vector<32x128xbf16>, vector<2x128xf32> -> vector<2x128xf32>
    %372 = arith.addf %370, %371 : vector<2x128xf32>
    %373 = arith.negf %372 : vector<2x128xf32>
    %374 = math.exp %373 : vector<2x128xf32>
    %cst_86 = arith.constant 1.000000e+00 : f32
    %375 = vector.broadcast %cst_86 : f32 to vector<2x128xf32>
    %376 = arith.addf %375, %374 : vector<2x128xf32>
    %377 = arith.divf %375, %376 : vector<2x128xf32>
    %378 = vector.extract_strided_slice %377 {offsets = [0, 0], sizes = [2, 32], strides = [1, 1]} : vector<2x128xf32> to vector<2x32xf32>
    %379 = vector.extract_strided_slice %377 {offsets = [0, 32], sizes = [2, 32], strides = [1, 1]} : vector<2x128xf32> to vector<2x32xf32>
    %380 = vector.extract_strided_slice %377 {offsets = [0, 64], sizes = [2, 32], strides = [1, 1]} : vector<2x128xf32> to vector<2x32xf32>
    %cst_87 = arith.constant 2.000000e+00 : f32
    %381 = vector.broadcast %cst_87 : f32 to vector<2x32xf32>
    %382 = arith.mulf %381, %380 : vector<2x32xf32>
    %cst_88 = arith.constant 1.000000e+00 : f32
    %383 = vector.broadcast %cst_88 : f32 to vector<2x32xf32>
    %384 = arith.subf %382, %383 : vector<2x32xf32>
    %385 = vector.extract_strided_slice %377 {offsets = [0, 96], sizes = [2, 32], strides = [1, 1]} : vector<2x128xf32> to vector<2x32xf32>
    %386 = arith.mulf %379, %341 : vector<2x32xf32>
    %387 = arith.mulf %378, %384 : vector<2x32xf32>
    %388 = arith.addf %386, %387 : vector<2x32xf32>
    %389 = math.tanh %388 : vector<2x32xf32>
    %390 = arith.mulf %385, %389 : vector<2x32xf32>
    %c0_89 = arith.constant 0 : index
    %c0_90 = arith.constant 0 : index
    %391 = vector.load %arg7[%c0_89, %c0_90] : memref<32x1xf32, #tpu.memory_space<vmem>>, vector<32x1xf32>
    %cst_91 = arith.constant dense<0.000000e+00> : vector<2x1xf32>
    %392 = tpu.matmul %390, %391, %cst_91 {dimension_numbers = #tpu.dot_dimension_numbers<[1], [0], [0], [1], [0, 0, 1, 1], [], []>} : vector<2x32xf32>, vector<32x1xf32>, vector<2x1xf32> -> vector<2x1xf32>
    %c0_92 = arith.constant 0 : index
    %c0_93 = arith.constant 0 : index
    %393 = vector.load %arg8[%c0_92, %c0_93] : memref<1x1xf32, #tpu.memory_space<vmem>>, vector<1x1xf32>
    %394 = vector.broadcast %393 : vector<1x1xf32> to vector<2x1xf32>
    %395 = arith.addf %392, %394 : vector<2x1xf32>
    %c0_94 = arith.constant 0 : index
    %c0_95 = arith.constant 0 : index
    %396 = vector.load %arg9[%c0_94, %c0_95] : memref<2x1xf32, #tpu.memory_space<vmem>>, vector<2x1xf32>
    tpu.vector_store %arg9[%c0_94, %c0_95], %395 {strides = array<i32>} : memref<2x1xf32, #tpu.memory_space<vmem>>, vector<2x1xf32>,
    return
  }
}

</mosaic_0001>

<bundles_post_ra>
// kernel: stock_lstm_forward.1
= control target key start
LH: loop header
LB: loop body
LE: loop exit
PB: predicated region body
PF: predicated region fallthrough
CT: control target
= control target key end

     0   :  { %vm63_vm0 = vcmask 1041408   ;;  %v2609_v0 = vmov 0.0   ;;  %vm2610_vm1 = vmmov 0   ;;  %vm59_vm2 = vcmask 31744   ;;  %s2613_s19 = smov 32   ;;  %s3146_s1 = inlined_call_operand.vmem [shape: bf16[4,128], index: 1, kind: input, shape index: {}]   ;;  %s3147_s2 = inlined_call_operand.vmem [shape: bf16[32,128], index: 2, kind: input, shape index: {}]   ;;  %s3148_s0 = inlined_call_operand.vmem [shape: f32[16,4], index: 0, kind: input, shape index: {}]   ;;  %s3149_s3 = inlined_call_operand.vmem [shape: f32[1,128], index: 3, kind: input, shape index: {}]   ;;  %s3150_s4 = inlined_call_operand.vmem [shape: bf16[32,128], index: 4, kind: input, shape index: {}]   ;;  %s3151_s5 = inlined_call_operand.vmem [shape: bf16[32,128], index: 5, kind: input, shape index: {}]   ;;  %s3152_s6 = inlined_call_operand.vmem [shape: f32[1,128], index: 6, kind: input, shape index: {}]   ;;  %s3153_s7 = inlined_call_operand.vmem [shape: f32[32,1], index: 7, kind: input, shape index: {}]   ;;  %s3154_s8 = inlined_call_operand.<no memory space> [shape: f32[1,1], index: 8, kind: input, shape index: {}]   ;;  %s3155_s9 = inlined_call_operand.vmem [shape: f32[2,1], index: 9, kind: output, shape index: {}]  }
   0x1   :  { %2238 = vmatprep.subr.bf16.mxu0 %v2609_v0  ;;  %v35_v1 = vld [vmem:[%s3146_s1] sm:$0x3]  ;;  %2244 = vmatprep.subr.bf16.mxu1 %v2609_v0  ;;  %v2672_v3 = vld [vmem:[%s3147_s2 + $0x8] sm:$0xff]   ;;  %v2611_v8 = vmov 0   ;;  %vm233_vm3 = vcmask 1041409   ;;  %vm120_vm4 = vcmask 261120  }
   0x2   :  { %v65_v2 = vsel %vm63_vm0, %v35_v1, 0  ;;  %2240 = vmatprep.mubr.msk.bf16.mxu0 %vm2610_vm1, %v2609_v0  ;;  %v50_v4 = vld [vmem:[%s3148_s0] sm:$0xff]  ;;  %v51_v5 = vld [vmem:[%s3148_s0 + $0x8] sm:$0xff]  ;;  %2248 = vmatprep.mubr.msk.bf16.mxu1 %vm2610_vm1, %v2609_v0  ;;  %vm2072_vm5 = vcmask 1024  }
   0x3   :  { %2239 = vmatpush3.bf16.msra.mxu0 %v65_v2  ;;  %v52_v6 = vpack.c.bf16 %v51_v5, %v50_v4  ;;  %2245 = vmatpush3.bf16.msra.mxu1 %v2672_v3  ;;  %v2688_v7 = vld [vmem:[%s3147_s2] sm:$0xff]   ;;  %v2722_v46 = vld [vmem:[%s3150_s4 + $0x8] sm:$0xff]  }
   0x4   :  { %2252 = vmatprep.subr.bf16.mxu0 %v2609_v0  ;;  %2246 = vmatprep.subr.bf16.mxu1 %v2609_v0  ;;  %v2078_v10 = vld [vmem:[%s3149_s3] ss:$0 sm:$0xff]  ;;  %s2612_s3 = smov 64   ;;  %v2727_v47 = vld [vmem:[%s3151_s5 + $0x8] sm:$0xff]  }
   0x5   :  { %v2733_v49 = vld [vmem:[%s3150_s4] sm:$0xff]  }
   0x6   :  { %2241 = vmatmul.mubr.msk.bf16.vlgmr.msra.gmra.mxu0 %vm59_vm2, %v52_v6  ;;  %v2741_v50 = vld [vmem:[%s3151_s5] sm:$0xff]  }
   0x7   :  { %2256 = vmatprep.mubr.msk.bf16.mxu0 %vm2610_vm1, %v2609_v0  ;;  %2247 = vmatpush3.bf16.msra.mxu1 %v2688_v7 }
   0x8   :  { %2260 = vmatprep.subr.bf16.mxu1 %v2609_v0  ;;  %2253 = vmatpush3.bf16.msra.mxu0 %v2722_v46 }
   0x9   :  { %2254 = vmatprep.subr.bf16.mxu0 %v2609_v0 }
   0xa   :  { %2249 = vmatmul.mubr.bf16.vlgmr.msra.gmra.mxu1 %v2611_v8 }
   0xb   :  { %2264 = vmatprep.mubr.msk.bf16.mxu1 %vm2610_vm1, %v2609_v0  ;;  %2261 = vmatpush3.bf16.msra.mxu1 %v2727_v47 }
   0xc   :  { %2262 = vmatprep.subr.bf16.mxu1 %v2609_v0  ;;  %2255 = vmatpush3.bf16.msra.mxu0 %v2733_v49 }
   0xd   :  { %2268 = vmatprep.subr.bf16.mxu0 %v2609_v0 }
   0xf   :  { %2263 = vmatpush3.bf16.msra.mxu1 %v2741_v50 }
  0x10   :  { %2276 = vmatprep.subr.bf16.mxu1 %v2609_v0 }
  0x12   :  { %2265 = vmatmul.mubr.bf16.vlgmr.msra.gmra.mxu1 %v2611_v8 }
  0x13   :  { %2277 = vmatpush3.bf16.msra.mxu1 %v2722_v46  ;;  %2280 = vmatprep.mubr.msk.bf16.mxu1 %vm2610_vm1, %v2609_v0 }
  0x14   :  { %2278 = vmatprep.subr.bf16.mxu1 %v2609_v0 }
  0x17   :  { %2279 = vmatpush3.bf16.msra.mxu1 %v2733_v49 }
  0x18   :  { %2292 = vmatprep.subr.bf16.mxu1 %v2609_v0 }
  0xc6   :  { %v101_v9 = vpop.f32.mrf.mxu0 }
  0xc7   :  { %v2702_v12 = vadd.f32 %v2078_v10, %v101_v9 }
  0xc8   :  { %v2242_v11 = vpop.f32.mrf.mxu0 }
  0xca   :  { %v104_v13 = vpop.f32.mrf.mxu0  ;;  %v158_v15 = vpop.f32.mrf.mxu1 }
  0xcb   :  { %v2704_v14 = vadd.f32 %v2078_v10, %v104_v13  ;;  %v165_v16 = vrot.slane %v158_v15, 1  ;;  %v168_v17 = vadd.f32 %v158_v15, %v2702_v12 }
  0xcc   :  { %v2243_v18 = vpop.f32.mrf.mxu0  ;;  %v2250_v19 = vpop.f32.mrf.mxu1 }
  0xcd   :  { %v169_v20 = vadd.f32 %v165_v16, %v2704_v14  ;;  %v2082_v21 = vmul.f32 -1.442695, %v168_v17 }
  0xce   :  { %v161_v22 = vpop.f32.mrf.mxu1 }
  0xcf   :  { %2458 = vpow2.f32 %v2082_v21  ;;  %v2083_v23 = vmul.f32 -1.442695, %v169_v20 }
  0xd0   :  { %v2251_v24 = vpop.f32.mrf.mxu1 }
  0xd1   :  { %2460 = vpow2.f32 %v2083_v23 }
  0xd2   :  { %v339_v63 = vpop.f32.mrf.mxu1 }
  0xd4   :  { %v2266_v1 = vpop.f32.mrf.mxu1 }
  0xd6   :  { %v342_v2 = vpop.f32.mrf.mxu1 }
  0xd8   :  { %v2267_v4 = vpop.f32.mrf.mxu1 }
  0xdc   :  { %v2459_v25 = vpop.eup %2458 }
  0xdd   :  { %v176_v26 = vadd.f32 1.0, %v2459_v25 }
  0xde   :  { %v2461_v27 = vpop.eup %2460 }
  0xdf   :  { %v177_v28 = vadd.f32 1.0, %v2461_v27  ;;  %2462 = vrcp.f32 %v176_v26 }
  0xe1   :  { %2464 = vrcp.f32 %v177_v28 }
  0xec   :  { %v2463_v29 = vpop.eup %2462 }
  0xed   :  { %v182_v33 = vmul.f32 2.0, %v2463_v29  ;;  %v186_v42 = vmul.f32 0.0, %v2463_v29 }
  0xee   :  { %v2465_v30 = vpop.eup %2464 }
  0xef   :  { %v183_v31 = vmul.f32 2.0, %v2465_v30  ;;  %v2084_v34 = vadd.f32 -1.0, %v182_v33  ;;  %v187_v39 = vmul.f32 0.0, %v2465_v30 }
  0xf1   :  { %v2085_v32 = vadd.f32 -1.0, %v183_v31  ;;  %v2778_v31 = vld [vmem:[%s3152_s6] ss:$0 sm:$0xff] }
  0xf3   :  { %192 = vrot.lane.b32.xlu0 %v2085_v32, %s2612_s3 }
  0xf7   :  { %190 = vrot.lane.b32.xlu0 %v2084_v34, %s2612_s3 }
 0x165   :  { %v193_v35 = vpop.permute.xlu0 %192 }
 0x166   :  { %v197_v36 = vmul.f32 %v2465_v30, %v193_v35 }
 0x168   :  { %202 = vrot.lane.b32.xlu1 %v197_v36, %s2613_s19 }
 0x169   :  { %v191_v37 = vpop.permute.xlu0 %190 }
 0x16a   :  { %v196_v38 = vmul.f32 %v2463_v29, %v191_v37 }
 0x16c   :  { %200 = vrot.lane.b32.xlu1 %v196_v38, %s2613_s19 }
 0x1da   :  { %v203_v40 = vpop.permute.xlu1 %202 }
 0x1db   :  { %v2712_v41 = vadd.f32 %v203_v40, %v187_v39 }
 0x1dd   :  { %2466 = vtanh.f32 %v2712_v41 }
 0x1de   :  { %v201_v43 = vpop.permute.xlu1 %200 }
 0x1df   :  { %v2715_v44 = vadd.f32 %v201_v43, %v186_v42 }
 0x1e1   :  { %2468 = vtanh.f32 %v2715_v44 }
 0x1ea   :  { %v2467_v45 = vpop.eup %2466 }
 0x1eb   :  { %214 = vrot.lane.b32.xlu0 %v2467_v45, %s2612_s3 }
 0x1ee   :  { %v2469_v48 = vpop.eup %2468 }
 0x1ef   :  { %212 = vrot.lane.b32.xlu1 %v2469_v48, %s2612_s3  ;;  %v437_v48 = vrot.slane %v2712_v41, 7 }
 0x25d   :  { %v215_v51 = vpop.permute.xlu0 %214 }
 0x25e   :  { %v219_v52 = vmul.f32 %v2465_v30, %v215_v51  ;;  %v436_v51 = vrot.slane %v2715_v44, 7 }
 0x260   :  { %v221_v53 = vpack.c.bf16 %v219_v52, %v219_v52 }
 0x261   :  { %v213_v54 = vpop.permute.xlu1 %212 }
 0x262   :  { %v231_v55 = vunpack.c.l.b16 %v221_v53  ;;  %v218_v56 = vmul.f32 %v2463_v29, %v213_v54 }
 0x264   :  { %v220_v57 = vpack.c.bf16 %v218_v56, %v218_v56  ;;  %v232_v58 = vrot.slane %v231_v55, 7 }
 0x266   :  { %v230_v59 = vunpack.c.l.b16 %v220_v57 }
 0x268   :  { %v234_v60 = vsel %vm233_vm3, %v232_v58, %v230_v59 }
 0x269   :  { %v235_v61 = vpack.c.b16 %v234_v60, %v234_v60 }
 0x26b   :  { %236 = vrot.lane.b32.xlu0 %v235_v61, %s2613_s19 }
 0x2dd   :  { %v237_v62 = vpop.permute.xlu0 %236 }
 0x2de   :  { %2257 = vmatmul.mubr.msk.bf16.vlgmr.msra.gmra.mxu0 %vm120_vm4, %v237_v62 }
 0x2df   :  { %2269 = vmatpush3.bf16.msra.mxu0 %v2672_v3  ;;  %2272 = vmatprep.mubr.msk.bf16.mxu0 %vm2610_vm1, %v2609_v0 }
 0x2e0   :  { %2270 = vmatprep.subr.bf16.mxu0 %v2609_v0 }
 0x2e3   :  { %2271 = vmatpush3.bf16.msra.mxu0 %v2688_v7 }
 0x2e4   :  { %2284 = vmatprep.subr.bf16.mxu0 %v2609_v0 }
 0x2e6   :  { %2273 = vmatmul.mubr.msk.bf16.vlgmr.msra.gmra.mxu0 %vm120_vm4, %v237_v62 }
 0x2e7   :  { %2285 = vmatpush3.bf16.msra.mxu0 %v2727_v47  ;;  %2288 = vmatprep.mubr.msk.bf16.mxu0 %vm2610_vm1, %v2609_v0 }
 0x2e8   :  { %2286 = vmatprep.subr.bf16.mxu0 %v2609_v0 }
 0x2eb   :  { %2287 = vmatpush3.bf16.msra.mxu0 %v2741_v50 }
 0x2ec   :  { %2300 = vmatprep.subr.bf16.mxu0 %v2609_v0 }
 0x39e   :  { %v287_v5 = vpop.f32.mrf.mxu0 }
 0x39f   :  { %v288_v32 = vadd.f32 %v2778_v31, %v287_v5 }
 0x3a0   :  { %v2258_v6 = vpop.f32.mrf.mxu0 }
 0x3a1   :  { %v345_v33 = vadd.f32 %v339_v63, %v288_v32 }
 0x3a2   :  { %v290_v8 = vpop.f32.mrf.mxu0 }
 0x3a3   :  { %v2092_v34 = vmul.f32 -1.442695, %v345_v33 }
 0x3a4   :  { %v2259_v9 = vpop.f32.mrf.mxu0 }
 0x3a6   :  { %v406_v10 = vpop.f32.mrf.mxu0 }
 0x3a7   :  { %v413_v11 = vrot.slane %v406_v10, 7  ;;  %v417_v13 = vadd.f32 %v406_v10, %v2704_v14 }
 0x3a8   :  { %v2274_v15 = vpop.f32.mrf.mxu0 }
 0x3a9   :  { %v416_v16 = vadd.f32 %v413_v11, %v2702_v12  ;;  %v2096_v17 = vmul.f32 -1.442695, %v417_v13 }
 0x3aa   :  { %v409_v18 = vpop.f32.mrf.mxu0 }
 0x3ab   :  { %v2095_v19 = vmul.f32 -1.442695, %v416_v16  ;;  %2470 = vpow2.f32 %v2096_v17 }
 0x3ac   :  { %v2275_v20 = vpop.f32.mrf.mxu0 }
 0x3ad   :  { %2472 = vpow2.f32 %v2095_v19 }
 0x3b8   :  { %v2471_v21 = vpop.eup %2470 }
 0x3b9   :  { %v425_v22 = vadd.f32 1.0, %v2471_v21 }
 0x3ba   :  { %v2473_v23 = vpop.eup %2472 }
 0x3bb   :  { %v424_v24 = vadd.f32 1.0, %v2473_v23  ;;  %2474 = vrcp.f32 %v425_v22 }
 0x3bd   :  { %2476 = vrcp.f32 %v424_v24 }
 0x3be   :  { %2478 = vpow2.f32 %v2092_v34 }
 0x3c8   :  { %v2475_v25 = vpop.eup %2474 }
 0x3c9   :  { %v431_v26 = vmul.f32 2.0, %v2475_v25  ;;  %v441_v52 = vmul.f32 %v2475_v25, %v437_v48 }
 0x3ca   :  { %v2477_v27 = vpop.eup %2476 }
 0x3cb   :  { %v2098_v28 = vadd.f32 -1.0, %v431_v26  ;;  %v430_v29 = vmul.f32 2.0, %v2477_v27  ;;  %v2479_v35 = vpop.eup %2478  ;;  %v440_v55 = vmul.f32 %v2477_v27, %v436_v51 }
 0x3cc   :  { %v349_v36 = vadd.f32 1.0, %v2479_v35 }
 0x3cd   :  { %446 = vrot.lane.b32.xlu0 %v2098_v28, %s2612_s3  ;;  %v2097_v30 = vadd.f32 -1.0, %v430_v29 }
 0x3ce   :  { %2480 = vrcp.f32 %v349_v36 }
 0x3cf   :  { %444 = vrot.lane.b32.xlu1 %v2097_v30, %s2612_s3 }
 0x3db   :  { %v2481_v37 = vpop.eup %2480 }
 0x3dc   :  { %v352_v43 = vmul.f32 2.0, %v2481_v37  ;;  %v354_v4 = vmul.f32 0.0, %v2481_v37 }
 0x3de   :  { %v2093_v45 = vadd.f32 -1.0, %v352_v43 }
 0x43f   :  { %v447_v38 = vpop.permute.xlu0 %446 }
 0x440   :  { %v451_v39 = vmul.f32 %v2475_v25, %v447_v38 }
 0x441   :  { %v445_v40 = vpop.permute.xlu1 %444 }
 0x442   :  { %v450_v42 = vmul.f32 %v2477_v27, %v445_v40  ;;  %456 = vrot.lane.b32.xlu0 %v451_v39, %s2613_s19 }
 0x444   :  { %454 = vrot.lane.b32.xlu1 %v450_v42, %s2613_s19 }
 0x448   :  { %356 = vrot.lane.b32.xlu1 %v2093_v45, %s2612_s3 }
 0x4b4   :  { %v457_v53 = vpop.permute.xlu0 %456 }
 0x4b5   :  { %v2786_v54 = vadd.f32 %v457_v53, %v441_v52 }
 0x4b6   :  { %v455_v56 = vpop.permute.xlu1 %454 }
 0x4b7   :  { %2482 = vtanh.f32 %v2786_v54  ;;  %v2789_v57 = vadd.f32 %v455_v56, %v440_v55 }
 0x4b9   :  { %2484 = vtanh.f32 %v2789_v57 }
 0x4ba   :  { %v357_v60 = vpop.permute.xlu1 %356 }
 0x4bb   :  { %v359_v41 = vmul.f32 %v2481_v37, %v357_v60 }
 0x4c4   :  { %v2483_v58 = vpop.eup %2482 }
 0x4c5   :  { %468 = vrot.lane.b32.xlu1 %v2483_v58, %s2612_s3 }
 0x4c6   :  { %v2485_v59 = vpop.eup %2484 }
 0x4c7   :  { %466 = vrot.lane.b32.xlu0 %v2485_v59, %s2612_s3 }
 0x4cb   :  { %361 = vrot.lane.b32.xlu0 %v359_v41, %s2613_s19 }
 0x537   :  { %v469_v44 = vpop.permute.xlu1 %468 }
 0x538   :  { %v473_v61 = vmul.f32 %v2475_v25, %v469_v44 }
 0x539   :  { %v467_v62 = vpop.permute.xlu0 %466 }
 0x53a   :  { %v472_v63 = vmul.f32 %v2477_v27, %v467_v62  ;;  %v475_v1 = vpack.c.bf16 %v473_v61, %v473_v61 }
 0x53c   :  { %v474_v2 = vpack.c.bf16 %v472_v63, %v472_v63  ;;  %v479_v9 = vunpack.c.l.b16 %v475_v1 }
 0x53d   :  { %v362_v5 = vpop.permute.xlu0 %361 }
 0x53e   :  { %v478_v6 = vunpack.c.l.b16 %v474_v2  ;;  %v2795_v8 = vadd.f32 %v362_v5, %v354_v4 }
 0x540   :  { %v480_v10 = vrot.slane %v478_v6, 1  ;;  %2486 = vtanh.f32 %v2795_v8  ;;  %v666_v6 = vrot.slane %v2789_v57, 7 }
 0x542   :  { %v481_v11 = vsel %vm233_vm3, %v479_v9, %v480_v10  ;;  %v667_v9 = vrot.slane %v2786_v54, 7 }
 0x543   :  { %v482_v13 = vpack.c.b16 %v481_v11, %v481_v11 }
 0x545   :  { %483 = vrot.lane.b32.xlu1 %v482_v13, %s2613_s19 }
 0x54d   :  { %v2487_v15 = vpop.eup %2486 }
 0x54e   :  { %367 = vrot.lane.b32.xlu0 %v2487_v15, %s2612_s3 }
 0x5b7   :  { %v484_v16 = vpop.permute.xlu1 %483 }
 0x5b8   :  { %2281 = vmatmul.mubr.msk.bf16.vlgmr.msra.gmra.mxu1 %vm120_vm4, %v484_v16 }
 0x5b9   :  { %2293 = vmatpush3.bf16.msra.mxu1 %v2672_v3  ;;  %2296 = vmatprep.mubr.msk.bf16.mxu1 %vm2610_vm1, %v2609_v0 }
 0x5ba   :  { %2294 = vmatprep.subr.bf16.mxu1 %v2609_v0 }
 0x5bd   :  { %2295 = vmatpush3.bf16.msra.mxu1 %v2688_v7 }
 0x5be   :  { %2308 = vmatprep.subr.bf16.mxu1 %v2609_v0 }
 0x5c0   :  { %v368_v17 = vpop.permute.xlu0 %367  ;;  %2297 = vmatmul.mubr.msk.bf16.vlgmr.msra.gmra.mxu1 %vm120_vm4, %v484_v16 }
 0x5c1   :  { %v370_v18 = vmul.f32 %v2481_v37, %v368_v17  ;;  %2309 = vmatpush3.bf16.msra.mxu1 %v2727_v47  ;;  %2312 = vmatprep.mubr.msk.bf16.mxu1 %vm2610_vm1, %v2609_v0 }
 0x5c2   :  { %2310 = vmatprep.subr.bf16.mxu1 %v2609_v0 }
 0x5c3   :  { %v371_v19 = vpack.c.bf16 %v370_v18, %v370_v18 }
 0x5c5   :  { %529 = vrot.lane.b32.xlu1 %v371_v19, %s2613_s19  ;;  %2311 = vmatpush3.bf16.msra.mxu1 %v2741_v50 }
 0x5c6   :  { %2324 = vmatprep.subr.bf16.mxu1 %v2609_v0 }
 0x637   :  { %v530_v20 = vpop.permute.xlu1 %529 }
 0x638   :  { %2289 = vmatmul.mubr.msk.bf16.vlgmr.msra.gmra.mxu0 %vm120_vm4, %v530_v20 }
 0x639   :  { %2301 = vmatpush3.bf16.msra.mxu0 %v2722_v46  ;;  %2304 = vmatprep.mubr.msk.bf16.mxu0 %vm2610_vm1, %v2609_v0 }
 0x63a   :  { %2302 = vmatprep.subr.bf16.mxu0 %v2609_v0 }
 0x63d   :  { %2303 = vmatpush3.bf16.msra.mxu0 %v2733_v49 }
 0x63e   :  { %2316 = vmatprep.subr.bf16.mxu0 %v2609_v0 }
 0x678   :  { %v522_v21 = vpop.f32.mrf.mxu1 }
 0x679   :  { %v523_v52 = vadd.f32 %v2778_v31, %v522_v21 }
 0x67a   :  { %v2282_v22 = vpop.f32.mrf.mxu1 }
 0x67c   :  { %v525_v23 = vpop.f32.mrf.mxu1 }
 0x67e   :  { %v2283_v24 = vpop.f32.mrf.mxu1 }
 0x680   :  { %v635_v25 = vpop.f32.mrf.mxu1 }
 0x681   :  { %v642_v26 = vrot.slane %v635_v25, 6  ;;  %v643_v27 = vrot.slane %v635_v25, 7 }
 0x682   :  { %v2298_v28 = vpop.f32.mrf.mxu1 }
 0x683   :  { %v646_v29 = vadd.f32 %v642_v26, %v2702_v12  ;;  %v647_v30 = vadd.f32 %v643_v27, %v2704_v14 }
 0x684   :  { %v638_v32 = vpop.f32.mrf.mxu1 }
 0x685   :  { %v2104_v33 = vmul.f32 -1.442695, %v646_v29  ;;  %v2105_v34 = vmul.f32 -1.442695, %v647_v30 }
 0x686   :  { %v2299_v35 = vpop.f32.mrf.mxu1 }
 0x687   :  { %2488 = vpow2.f32 %v2104_v33 }
 0x688   :  { %2490 = vpow2.f32 %v2105_v34 }
 0x694   :  { %v2489_v36 = vpop.eup %2488 }
 0x695   :  { %v2491_v37 = vpop.eup %2490  ;;  %v654_v38 = vadd.f32 1.0, %v2489_v36 }
 0x696   :  { %v655_v39 = vadd.f32 1.0, %v2491_v37 }
 0x697   :  { %2492 = vrcp.f32 %v654_v38 }
 0x698   :  { %2494 = vrcp.f32 %v655_v39 }
 0x6a4   :  { %v2493_v40 = vpop.eup %2492 }
 0x6a5   :  { %v2495_v42 = vpop.eup %2494  ;;  %v660_v43 = vmul.f32 2.0, %v2493_v40  ;;  %v670_v10 = vmul.f32 %v2493_v40, %v666_v6 }
 0x6a6   :  { %v661_v45 = vmul.f32 2.0, %v2495_v42  ;;  %v671_v13 = vmul.f32 %v2495_v42, %v667_v9 }
 0x6a7   :  { %v2106_v48 = vadd.f32 -1.0, %v660_v43 }
 0x6a8   :  { %v2107_v51 = vadd.f32 -1.0, %v661_v45 }
 0x6a9   :  { %674 = vrot.lane.b32.xlu0 %v2106_v48, %s2612_s3 }
 0x6aa   :  { %676 = vrot.lane.b32.xlu1 %v2107_v51, %s2612_s3 }
 0x6f8   :  { %v568_v53 = vpop.f32.mrf.mxu0 }
 0x6f9   :  { %v574_v55 = vadd.f32 %v568_v53, %v523_v52 }
 0x6fa   :  { %v2290_v56 = vpop.f32.mrf.mxu0 }
 0x6fb   :  { %v2101_v58 = vmul.f32 -1.442695, %v574_v55 }
 0x6fc   :  { %v571_v59 = vpop.f32.mrf.mxu0 }
 0x6fd   :  { %2496 = vpow2.f32 %v2101_v58 }
 0x6fe   :  { %v2291_v60 = vpop.f32.mrf.mxu0 }
 0x70a   :  { %v2497_v41 = vpop.eup %2496 }
 0x70b   :  { %v578_v44 = vadd.f32 1.0, %v2497_v41 }
 0x70d   :  { %2498 = vrcp.f32 %v578_v44 }
 0x71a   :  { %v2499_v61 = vpop.eup %2498 }
 0x71b   :  { %v675_v62 = vpop.permute.xlu0 %674  ;;  %v581_v2 = vmul.f32 2.0, %v2499_v61  ;;  %v583_v25 = vmul.f32 %v2499_v61, %v2795_v8 }
 0x71c   :  { %v680_v63 = vmul.f32 %v2493_v40, %v675_v62  ;;  %v677_v1 = vpop.permute.xlu1 %676 }
 0x71d   :  { %v681_v4 = vmul.f32 %v2495_v42, %v677_v1  ;;  %v2102_v5 = vadd.f32 -1.0, %v581_v2 }
 0x71e   :  { %684 = vrot.lane.b32.xlu0 %v680_v63, %s2613_s19 }
 0x71f   :  { %686 = vrot.lane.b32.xlu1 %v681_v4, %s2613_s19 }
 0x722   :  { %585 = vrot.lane.b32.xlu0 %v2102_v5, %s2612_s3 }
 0x790   :  { %v685_v11 = vpop.permute.xlu0 %684 }
 0x791   :  { %v2833_v15 = vadd.f32 %v685_v11, %v670_v10  ;;  %v687_v16 = vpop.permute.xlu1 %686 }
 0x792   :  { %v2835_v17 = vadd.f32 %v687_v16, %v671_v13 }
 0x793   :  { %2500 = vtanh.f32 %v2833_v15 }
 0x794   :  { %2502 = vtanh.f32 %v2835_v17  ;;  %v586_v19 = vpop.permute.xlu0 %585 }
 0x795   :  { %v588_v54 = vmul.f32 %v2499_v61, %v586_v19 }
 0x7a0   :  { %v2501_v18 = vpop.eup %2500 }
 0x7a1   :  { %v2503_v20 = vpop.eup %2502  ;;  %696 = vrot.lane.b32.xlu1 %v2501_v18, %s2612_s3 }
 0x7a2   :  { %698 = vrot.lane.b32.xlu0 %v2503_v20, %s2612_s3 }
 0x7a5   :  { %590 = vrot.lane.b32.xlu1 %v588_v54, %s2613_s19 }
 0x813   :  { %v697_v57 = vpop.permute.xlu1 %696 }
 0x814   :  { %v702_v21 = vmul.f32 %v2493_v40, %v697_v57  ;;  %v699_v22 = vpop.permute.xlu0 %698 }
 0x815   :  { %v703_v23 = vmul.f32 %v2495_v42, %v699_v22 }
 0x816   :  { %v704_v24 = vpack.c.bf16 %v702_v21, %v702_v21 }
 0x817   :  { %v705_v26 = vpack.c.bf16 %v703_v23, %v703_v23  ;;  %v591_v27 = vpop.permute.xlu1 %590 }
 0x818   :  { %v708_v28 = vunpack.c.l.b16 %v704_v24  ;;  %v2843_v29 = vadd.f32 %v591_v27, %v583_v25 }
 0x819   :  { %v709_v30 = vunpack.c.l.b16 %v705_v26 }
 0x81a   :  { %v710_v32 = vrot.slane %v708_v28, 2  ;;  %2504 = vtanh.f32 %v2843_v29 }
 0x81b   :  { %v711_v33 = vrot.slane %v709_v30, 1  ;;  %v897_v30 = vrot.slane %v2833_v15, 7 }
 0x81d   :  { %v712_v34 = vsel %vm233_vm3, %v711_v33, %v710_v32  ;;  %v898_v32 = vrot.slane %v2835_v17, 7 }
 0x81e   :  { %v713_v35 = vpack.c.b16 %v712_v34, %v712_v34 }
 0x820   :  { %714 = vrot.lane.b32.xlu0 %v713_v35, %s2613_s19 }
 0x827   :  { %v2505_v36 = vpop.eup %2504 }
 0x828   :  { %596 = vrot.lane.b32.xlu1 %v2505_v36, %s2612_s3 }
 0x892   :  { %v715_v37 = vpop.permute.xlu0 %714 }
 0x893   :  { %2305 = vmatmul.mubr.msk.bf16.vlgmr.msra.gmra.mxu0 %vm120_vm4, %v715_v37 }
 0x894   :  { %2317 = vmatpush3.bf16.msra.mxu0 %v2672_v3  ;;  %2320 = vmatprep.mubr.msk.bf16.mxu0 %vm2610_vm1, %v2609_v0 }
 0x895   :  { %2318 = vmatprep.subr.bf16.mxu0 %v2609_v0 }
 0x898   :  { %2319 = vmatpush3.bf16.msra.mxu0 %v2688_v7 }
 0x899   :  { %2332 = vmatprep.subr.bf16.mxu0 %v2609_v0 }
 0x89a   :  { %v597_v8 = vpop.permute.xlu1 %596 }
 0x89b   :  { %v599_v38 = vmul.f32 %v2499_v61, %v597_v8  ;;  %2321 = vmatmul.mubr.msk.bf16.vlgmr.msra.gmra.mxu0 %vm120_vm4, %v715_v37 }
 0x89c   :  { %2333 = vmatpush3.bf16.msra.mxu0 %v2727_v47  ;;  %2336 = vmatprep.mubr.msk.bf16.mxu0 %vm2610_vm1, %v2609_v0 }
 0x89d   :  { %v600_v39 = vpack.c.bf16 %v599_v38, %v599_v38  ;;  %2334 = vmatprep.subr.bf16.mxu0 %v2609_v0 }
 0x89f   :  { %760 = vrot.lane.b32.xlu0 %v600_v39, %s2613_s19 }
 0x8a0   :  { %2335 = vmatpush3.bf16.msra.mxu0 %v2741_v50 }
 0x8a1   :  { %2348 = vmatprep.subr.bf16.mxu0 %v2609_v0 }
 0x911   :  { %v761_v40 = vpop.permute.xlu0 %760 }
 0x912   :  { %2313 = vmatmul.mubr.msk.bf16.vlgmr.msra.gmra.mxu1 %vm120_vm4, %v761_v40 }
 0x913   :  { %2325 = vmatpush3.bf16.msra.mxu1 %v2722_v46  ;;  %2328 = vmatprep.mubr.msk.bf16.mxu1 %vm2610_vm1, %v2609_v0 }
 0x914   :  { %2326 = vmatprep.subr.bf16.mxu1 %v2609_v0 }
 0x917   :  { %2327 = vmatpush3.bf16.msra.mxu1 %v2733_v49 }
 0x918   :  { %2340 = vmatprep.subr.bf16.mxu1 %v2609_v0 }
 0x953   :  { %v753_v42 = vpop.f32.mrf.mxu0 }
 0x954   :  { %v754_v11 = vadd.f32 %v2778_v31, %v753_v42 }
 0x955   :  { %v2306_v43 = vpop.f32.mrf.mxu0 }
 0x957   :  { %v756_v45 = vpop.f32.mrf.mxu0 }
 0x959   :  { %v2307_v48 = vpop.f32.mrf.mxu0 }
 0x95b   :  { %v866_v51 = vpop.f32.mrf.mxu0 }
 0x95c   :  { %v873_v52 = vrot.slane %v866_v51, 5  ;;  %v874_v53 = vrot.slane %v866_v51, 6 }
 0x95d   :  { %v2322_v55 = vpop.f32.mrf.mxu0 }
 0x95e   :  { %v877_v56 = vadd.f32 %v873_v52, %v2702_v12  ;;  %v878_v58 = vadd.f32 %v874_v53, %v2704_v14 }
 0x95f   :  { %v869_v59 = vpop.f32.mrf.mxu0 }
 0x960   :  { %v2113_v60 = vmul.f32 -1.442695, %v877_v56  ;;  %v2114_v41 = vmul.f32 -1.442695, %v878_v58 }
 0x961   :  { %v2323_v44 = vpop.f32.mrf.mxu0 }
 0x962   :  { %2506 = vpow2.f32 %v2113_v60 }
 0x963   :  { %2508 = vpow2.f32 %v2114_v41 }
 0x96f   :  { %v2507_v61 = vpop.eup %2506 }
 0x970   :  { %v2509_v62 = vpop.eup %2508  ;;  %v885_v63 = vadd.f32 1.0, %v2507_v61 }
 0x971   :  { %v886_v1 = vadd.f32 1.0, %v2509_v62 }
 0x972   :  { %2510 = vrcp.f32 %v885_v63 }
 0x973   :  { %2512 = vrcp.f32 %v886_v1 }
 0x97f   :  { %v2511_v2 = vpop.eup %2510 }
 0x980   :  { %v2513_v4 = vpop.eup %2512  ;;  %v891_v5 = vmul.f32 2.0, %v2511_v2  ;;  %v901_v33 = vmul.f32 %v2511_v2, %v897_v30 }
 0x981   :  { %v892_v6 = vmul.f32 2.0, %v2513_v4  ;;  %v902_v34 = vmul.f32 %v2513_v4, %v898_v32 }
 0x982   :  { %v2115_v9 = vadd.f32 -1.0, %v891_v5 }
 0x983   :  { %v2116_v10 = vadd.f32 -1.0, %v892_v6 }
 0x984   :  { %905 = vrot.lane.b32.xlu1 %v2115_v9, %s2612_s3 }
 0x985   :  { %907 = vrot.lane.b32.xlu0 %v2116_v10, %s2612_s3 }
 0x9d2   :  { %v799_v13 = vpop.f32.mrf.mxu1 }
 0x9d3   :  { %v805_v16 = vadd.f32 %v799_v13, %v754_v11 }
 0x9d4   :  { %v2314_v18 = vpop.f32.mrf.mxu1 }
 0x9d5   :  { %v2110_v19 = vmul.f32 -1.442695, %v805_v16 }
 0x9d6   :  { %v802_v20 = vpop.f32.mrf.mxu1 }
 0x9d7   :  { %2514 = vpow2.f32 %v2110_v19 }
 0x9d8   :  { %v2315_v54 = vpop.f32.mrf.mxu1 }
 0x9e4   :  { %v2515_v57 = vpop.eup %2514 }
 0x9e5   :  { %v809_v21 = vadd.f32 1.0, %v2515_v57 }
 0x9e7   :  { %2516 = vrcp.f32 %v809_v21 }
 0x9f4   :  { %v2517_v22 = vpop.eup %2516 }
 0x9f5   :  { %v812_v26 = vmul.f32 2.0, %v2517_v22  ;;  %v814_v51 = vmul.f32 %v2517_v22, %v2843_v29 }
 0x9f6   :  { %v906_v23 = vpop.permute.xlu1 %905 }
 0x9f7   :  { %v908_v24 = vpop.permute.xlu0 %907  ;;  %v911_v25 = vmul.f32 %v2511_v2, %v906_v23  ;;  %v2111_v28 = vadd.f32 -1.0, %v812_v26 }
 0x9f8   :  { %v912_v27 = vmul.f32 %v2513_v4, %v908_v24 }
 0x9f9   :  { %915 = vrot.lane.b32.xlu1 %v911_v25, %s2613_s19 }
 0x9fa   :  { %917 = vrot.lane.b32.xlu0 %v912_v27, %s2613_s19 }
 0x9fd   :  { %816 = vrot.lane.b32.xlu1 %v2111_v28, %s2612_s3 }
 0xa6b   :  { %v916_v35 = vpop.permute.xlu1 %915 }
 0xa6c   :  { %v918_v36 = vpop.permute.xlu0 %917  ;;  %v2881_v37 = vadd.f32 %v916_v35, %v901_v33 }
 0xa6d   :  { %v2883_v8 = vadd.f32 %v918_v36, %v902_v34 }
 0xa6e   :  { %2518 = vtanh.f32 %v2881_v37 }
 0xa6f   :  { %2520 = vtanh.f32 %v2883_v8  ;;  %v817_v39 = vpop.permute.xlu1 %816 }
 0xa70   :  { %v819_v15 = vmul.f32 %v2517_v22, %v817_v39 }
 0xa7b   :  { %v2519_v38 = vpop.eup %2518 }
 0xa7c   :  { %v2521_v40 = vpop.eup %2520  ;;  %927 = vrot.lane.b32.xlu0 %v2519_v38, %s2612_s3 }
 0xa7d   :  { %929 = vrot.lane.b32.xlu1 %v2521_v40, %s2612_s3 }
 0xa80   :  { %821 = vrot.lane.b32.xlu0 %v819_v15, %s2613_s19 }
 0xaee   :  { %v928_v17 = vpop.permute.xlu0 %927 }
 0xaef   :  { %v933_v42 = vmul.f32 %v2511_v2, %v928_v17  ;;  %v930_v43 = vpop.permute.xlu1 %929 }
 0xaf0   :  { %v934_v45 = vmul.f32 %v2513_v4, %v930_v43 }
 0xaf1   :  { %v935_v48 = vpack.c.bf16 %v933_v42, %v933_v42 }
 0xaf2   :  { %v936_v52 = vpack.c.bf16 %v934_v45, %v934_v45  ;;  %v822_v53 = vpop.permute.xlu0 %821 }
 0xaf3   :  { %v939_v55 = vunpack.c.l.b16 %v935_v48  ;;  %v2891_v56 = vadd.f32 %v822_v53, %v814_v51  ;;  %v1128_v53 = vrot.slane %v2881_v37, 7 }
 0xaf4   :  { %v940_v58 = vunpack.c.l.b16 %v936_v52 }
 0xaf5   :  { %v941_v59 = vrot.slane %v939_v55, 3  ;;  %2522 = vtanh.f32 %v2891_v56 }
 0xaf6   :  { %v942_v60 = vrot.slane %v940_v58, 2 }
 0xaf8   :  { %v943_v41 = vsel %vm233_vm3, %v942_v60, %v941_v59  ;;  %v1129_v60 = vrot.slane %v2883_v8, 7 }
 0xaf9   :  { %v944_v44 = vpack.c.b16 %v943_v41, %v943_v41 }
 0xafb   :  { %945 = vrot.lane.b32.xlu1 %v944_v44, %s2613_s19 }
 0xb02   :  { %v2523_v61 = vpop.eup %2522 }
 0xb03   :  { %827 = vrot.lane.b32.xlu0 %v2523_v61, %s2612_s3 }
 0xb6d   :  { %v946_v62 = vpop.permute.xlu1 %945 }
 0xb6e   :  { %2329 = vmatmul.mubr.msk.bf16.vlgmr.msra.gmra.mxu1 %vm120_vm4, %v946_v62 }
 0xb6f   :  { %2341 = vmatpush3.bf16.msra.mxu1 %v2672_v3  ;;  %2344 = vmatprep.mubr.msk.bf16.mxu1 %vm2610_vm1, %v2609_v0 }
 0xb70   :  { %2342 = vmatprep.subr.bf16.mxu1 %v2609_v0 }
 0xb73   :  { %2343 = vmatpush3.bf16.msra.mxu1 %v2688_v7 }
 0xb74   :  { %2356 = vmatprep.subr.bf16.mxu1 %v2609_v0 }
 0xb75   :  { %v828_v29 = vpop.permute.xlu0 %827 }
 0xb76   :  { %v830_v63 = vmul.f32 %v2517_v22, %v828_v29  ;;  %2345 = vmatmul.mubr.msk.bf16.vlgmr.msra.gmra.mxu1 %vm120_vm4, %v946_v62 }
 0xb77   :  { %2357 = vmatpush3.bf16.msra.mxu1 %v2727_v47  ;;  %2360 = vmatprep.mubr.msk.bf16.mxu1 %vm2610_vm1, %v2609_v0 }
 0xb78   :  { %v831_v1 = vpack.c.bf16 %v830_v63, %v830_v63  ;;  %2358 = vmatprep.subr.bf16.mxu1 %v2609_v0 }
 0xb7a   :  { %991 = vrot.lane.b32.xlu1 %v831_v1, %s2613_s19 }
 0xb7b   :  { %2359 = vmatpush3.bf16.msra.mxu1 %v2741_v50 }
 0xb7c   :  { %2372 = vmatprep.subr.bf16.mxu1 %v2609_v0 }
 0xbec   :  { %v992_v3 = vpop.permute.xlu1 %991 }
 0xbed   :  { %2337 = vmatmul.mubr.msk.bf16.vlgmr.msra.gmra.mxu0 %vm120_vm4, %v992_v3 }
 0xbee   :  { %2349 = vmatpush3.bf16.msra.mxu0 %v2722_v46  ;;  %2352 = vmatprep.mubr.msk.bf16.mxu0 %vm2610_vm1, %v2609_v0 }
 0xbef   :  { %2350 = vmatprep.subr.bf16.mxu0 %v2609_v0 }
 0xbf2   :  { %2351 = vmatpush3.bf16.msra.mxu0 %v2733_v49 }
 0xbf3   :  { %2364 = vmatprep.subr.bf16.mxu0 %v2609_v0 }
 0xc2e   :  { %v984_v7 = vpop.f32.mrf.mxu1 }
 0xc2f   :  { %v985_v32 = vadd.f32 %v2778_v31, %v984_v7 }
 0xc30   :  { %v2330_v2 = vpop.f32.mrf.mxu1 }
 0xc32   :  { %v987_v4 = vpop.f32.mrf.mxu1 }
 0xc34   :  { %v2331_v5 = vpop.f32.mrf.mxu1 }
 0xc36   :  { %v1097_v6 = vpop.f32.mrf.mxu1 }
 0xc37   :  { %v1104_v9 = vrot.slane %v1097_v6, 4  ;;  %v1105_v10 = vrot.slane %v1097_v6, 5 }
 0xc38   :  { %v2346_v11 = vpop.f32.mrf.mxu1 }
 0xc39   :  { %v1108_v13 = vadd.f32 %v1104_v9, %v2702_v12  ;;  %v1109_v16 = vadd.f32 %v1105_v10, %v2704_v14 }
 0xc3a   :  { %v1100_v18 = vpop.f32.mrf.mxu1 }
 0xc3b   :  { %v2122_v19 = vmul.f32 -1.442695, %v1108_v13  ;;  %v2123_v20 = vmul.f32 -1.442695, %v1109_v16 }
 0xc3c   :  { %v2347_v54 = vpop.f32.mrf.mxu1 }
 0xc3d   :  { %2524 = vpow2.f32 %v2122_v19 }
 0xc3e   :  { %2526 = vpow2.f32 %v2123_v20 }
 0xc4a   :  { %v2525_v57 = vpop.eup %2524 }
 0xc4b   :  { %v2527_v21 = vpop.eup %2526  ;;  %v1116_v22 = vadd.f32 1.0, %v2525_v57 }
 0xc4c   :  { %v1117_v23 = vadd.f32 1.0, %v2527_v21 }
 0xc4d   :  { %2528 = vrcp.f32 %v1116_v22  ;;  %v2950_v22 = vld [vmem:[%s3147_s2 + $0x8] sm:$0xff]  }
 0xc4e   :  { %2530 = vrcp.f32 %v1117_v23  ;;  %v2959_v23 = vld [vmem:[%s3147_s2] sm:$0xff]  }
 0xc5a   :  { %v2529_v24 = vpop.eup %2528 }
 0xc5b   :  { %v2531_v25 = vpop.eup %2530  ;;  %v1122_v26 = vmul.f32 2.0, %v2529_v24  ;;  %v1132_v55 = vmul.f32 %v2529_v24, %v1128_v53 }
 0xc5c   :  { %v1123_v27 = vmul.f32 2.0, %v2531_v25  ;;  %v1133_v61 = vmul.f32 %v2531_v25, %v1129_v60 }
 0xc5d   :  { %v2124_v28 = vadd.f32 -1.0, %v1122_v26 }
 0xc5e   :  { %v2125_v30 = vadd.f32 -1.0, %v1123_v27 }
 0xc5f   :  { %1136 = vrot.lane.b32.xlu0 %v2124_v28, %s2612_s3 }
 0xc60   :  { %1138 = vrot.lane.b32.xlu1 %v2125_v30, %s2612_s3 }
 0xcad   :  { %v1030_v33 = vpop.f32.mrf.mxu0 }
 0xcae   :  { %v1036_v34 = vadd.f32 %v1030_v33, %v985_v32 }
 0xcaf   :  { %v2338_v35 = vpop.f32.mrf.mxu0 }
 0xcb0   :  { %v2119_v36 = vmul.f32 -1.442695, %v1036_v34 }
 0xcb1   :  { %v1033_v38 = vpop.f32.mrf.mxu0 }
 0xcb2   :  { %2532 = vpow2.f32 %v2119_v36 }
 0xcb3   :  { %v2339_v39 = vpop.f32.mrf.mxu0 }
 0xcbf   :  { %v2533_v40 = vpop.eup %2532 }
 0xcc0   :  { %v1040_v15 = vadd.f32 1.0, %v2533_v40 }
 0xcc2   :  { %2534 = vrcp.f32 %v1040_v15 }
 0xccf   :  { %v2535_v17 = vpop.eup %2534 }
 0xcd0   :  { %v1043_v42 = vmul.f32 2.0, %v2535_v17  ;;  %v1045_v8 = vmul.f32 %v2535_v17, %v2891_v56 }
 0xcd1   :  { %v1137_v43 = vpop.permute.xlu0 %1136 }
 0xcd2   :  { %v1142_v45 = vmul.f32 %v2529_v24, %v1137_v43  ;;  %v2120_v48 = vadd.f32 -1.0, %v1043_v42  ;;  %v1139_v51 = vpop.permute.xlu1 %1138 }
 0xcd3   :  { %v1143_v52 = vmul.f32 %v2531_v25, %v1139_v51 }
 0xcd4   :  { %1146 = vrot.lane.b32.xlu1 %v1142_v45, %s2613_s19  ;;  %1047 = vrot.lane.b32.xlu0 %v2120_v48, %s2612_s3 }
 0xcd8   :  { %1148 = vrot.lane.b32.xlu0 %v1143_v52, %s2613_s19 }
 0xd46   :  { %v1147_v58 = vpop.permute.xlu1 %1146  ;;  %v1048_v59 = vpop.permute.xlu0 %1047 }
 0xd47   :  { %v2929_v41 = vadd.f32 %v1147_v58, %v1132_v55  ;;  %v1050_v44 = vmul.f32 %v2535_v17, %v1048_v59 }
 0xd49   :  { %2536 = vtanh.f32 %v2929_v41  ;;  %1052 = vrot.lane.b32.xlu1 %v1050_v44, %s2613_s19 }
 0xd4a   :  { %v1149_v62 = vpop.permute.xlu0 %1148 }
 0xd4b   :  { %v2933_v29 = vadd.f32 %v1149_v62, %v1133_v61 }
 0xd4d   :  { %2538 = vtanh.f32 %v2933_v29 }
 0xd56   :  { %v2537_v63 = vpop.eup %2536 }
 0xd57   :  { %1158 = vrot.lane.b32.xlu0 %v2537_v63, %s2612_s3 }
 0xd5a   :  { %v2539_v37 = vpop.eup %2538 }
 0xd5b   :  { %1160 = vrot.lane.b32.xlu1 %v2539_v37, %s2612_s3 }
 0xdbb   :  { %v1053_v1 = vpop.permute.xlu1 %1052 }
 0xdbc   :  { %v2939_v3 = vadd.f32 %v1053_v1, %v1045_v8 }
 0xdbe   :  { %2540 = vtanh.f32 %v2939_v3 }
 0xdc9   :  { %v1159_v7 = vpop.permute.xlu0 %1158 }
 0xdca   :  { %v1164_v2 = vmul.f32 %v2529_v24, %v1159_v7 }
 0xdcb   :  { %v2541_v4 = vpop.eup %2540 }
 0xdcc   :  { %v1166_v5 = vpack.c.bf16 %v1164_v2, %v1164_v2  ;;  %1058 = vrot.lane.b32.xlu0 %v2541_v4, %s2612_s3 }
 0xdcd   :  { %v1161_v6 = vpop.permute.xlu1 %1160 }
 0xdce   :  { %v1165_v9 = vmul.f32 %v2531_v25, %v1161_v6  ;;  %v1170_v10 = vunpack.c.l.b16 %v1166_v5  ;;  %v1359_v6 = vrot.slane %v2929_v41, 7 }
 0xdd0   :  { %v1167_v11 = vpack.c.bf16 %v1165_v9, %v1165_v9  ;;  %v1172_v16 = vrot.slane %v1170_v10, 4  ;;  %v1360_v9 = vrot.slane %v2933_v29, 7 }
 0xdd2   :  { %v1171_v13 = vunpack.c.l.b16 %v1167_v11 }
 0xdd4   :  { %v1173_v18 = vrot.slane %v1171_v13, 3 }
 0xdd6   :  { %v1174_v56 = vsel %vm233_vm3, %v1173_v18, %v1172_v16 }
 0xdd7   :  { %v1175_v19 = vpack.c.b16 %v1174_v56, %v1174_v56 }
 0xdd9   :  { %1176 = vrot.lane.b32.xlu1 %v1175_v19, %s2613_s19 }
 0xe3e   :  { %v1059_v20 = vpop.permute.xlu0 %1058 }
 0xe3f   :  { %v1061_v54 = vmul.f32 %v2535_v17, %v1059_v20 }
 0xe41   :  { %v1062_v57 = vpack.c.bf16 %v1061_v54, %v1061_v54 }
 0xe43   :  { %1222 = vrot.lane.b32.xlu0 %v1062_v57, %s2613_s19 }
 0xe4b   :  { %v1177_v21 = vpop.permute.xlu1 %1176 }
 0xe4c   :  { %2353 = vmatmul.mubr.msk.bf16.vlgmr.msra.gmra.mxu0 %vm120_vm4, %v1177_v21 }
 0xe4d   :  { %2365 = vmatpush3.bf16.msra.mxu0 %v2950_v22  ;;  %2368 = vmatprep.mubr.msk.bf16.mxu0 %vm2610_vm1, %v2609_v0 }
 0xe4e   :  { %2366 = vmatprep.subr.bf16.mxu0 %v2609_v0 }
 0xe51   :  { %2367 = vmatpush3.bf16.msra.mxu0 %v2959_v23 }
 0xe52   :  { %2380 = vmatprep.subr.bf16.mxu0 %v2609_v0 }
 0xe54   :  { %2369 = vmatmul.mubr.msk.bf16.vlgmr.msra.gmra.mxu0 %vm120_vm4, %v1177_v21 }
 0xe55   :  { %2381 = vmatpush3.bf16.msra.mxu0 %v2727_v47  ;;  %2384 = vmatprep.mubr.msk.bf16.mxu0 %vm2610_vm1, %v2609_v0 }
 0xe56   :  { %2382 = vmatprep.subr.bf16.mxu0 %v2609_v0 }
 0xe59   :  { %2383 = vmatpush3.bf16.msra.mxu0 %v2741_v50 }
 0xe5a   :  { %2396 = vmatprep.subr.bf16.mxu0 %v2609_v0 }
 0xeb5   :  { %v1223_v24 = vpop.permute.xlu0 %1222 }
 0xeb6   :  { %2361 = vmatmul.mubr.msk.bf16.vlgmr.msra.gmra.mxu1 %vm120_vm4, %v1223_v24 }
 0xeb7   :  { %2373 = vmatpush3.bf16.msra.mxu1 %v2722_v46  ;;  %2376 = vmatprep.mubr.msk.bf16.mxu1 %vm2610_vm1, %v2609_v0 }
 0xeb8   :  { %2374 = vmatprep.subr.bf16.mxu1 %v2609_v0 }
 0xebb   :  { %2375 = vmatpush3.bf16.msra.mxu1 %v2733_v49 }
 0xebc   :  { %2388 = vmatprep.subr.bf16.mxu1 %v2609_v0 }
 0xf0c   :  { %v1215_v47 = vpop.f32.mrf.mxu0 }
 0xf0d   :  { %v1216_v52 = vadd.f32 %v2778_v31, %v1215_v47 }
 0xf0e   :  { %v2354_v25 = vpop.f32.mrf.mxu0 }
 0xf10   :  { %v1218_v26 = vpop.f32.mrf.mxu0 }
 0xf12   :  { %v2355_v50 = vpop.f32.mrf.mxu0 }
 0xf14   :  { %v1328_v27 = vpop.f32.mrf.mxu0 }
 0xf15   :  { %v1335_v28 = vrot.slane %v1328_v27, 3  ;;  %v1336_v30 = vrot.slane %v1328_v27, 4 }
 0xf16   :  { %v2370_v32 = vpop.f32.mrf.mxu0 }
 0xf17   :  { %v1339_v33 = vadd.f32 %v1335_v28, %v2702_v12  ;;  %v1340_v46 = vadd.f32 %v1336_v30, %v2704_v14 }
 0xf18   :  { %v1331_v34 = vpop.f32.mrf.mxu0 }
 0xf19   :  { %v2131_v35 = vmul.f32 -1.442695, %v1339_v33  ;;  %v2132_v36 = vmul.f32 -1.442695, %v1340_v46 }
 0xf1a   :  { %v2371_v38 = vpop.f32.mrf.mxu0 }
 0xf1b   :  { %2542 = vpow2.f32 %v2131_v35  ;;  %v3015_v38 = vld [vmem:[%s3151_s5 + $0x8] sm:$0xff]  }
 0xf1c   :  { %2544 = vpow2.f32 %v2132_v36 }
 0xf28   :  { %v2543_v49 = vpop.eup %2542 }
 0xf29   :  { %v2545_v39 = vpop.eup %2544  ;;  %v1347_v40 = vadd.f32 1.0, %v2543_v49  ;;  %v3024_v49 = vld [vmem:[%s3151_s5] sm:$0xff]  }
 0xf2a   :  { %v1348_v15 = vadd.f32 1.0, %v2545_v39 }
 0xf2b   :  { %2546 = vrcp.f32 %v1347_v40  ;;  %v3032_v40 = vld [vmem:[%s3150_s4 + $0x8] sm:$0xff]  }
 0xf2c   :  { %2548 = vrcp.f32 %v1348_v15  ;;  %v3041_v15 = vld [vmem:[%s3150_s4] sm:$0xff]  }
 0xf38   :  { %v2547_v17 = vpop.eup %2546 }
 0xf39   :  { %v2549_v42 = vpop.eup %2548  ;;  %v1353_v43 = vmul.f32 2.0, %v2547_v17  ;;  %v1363_v10 = vmul.f32 %v2547_v17, %v1359_v6  ;;  %v3052_v6 = vld [vmem:[%s3152_s6] ss:$0 sm:$0xff] }
 0xf3a   :  { %v1354_v45 = vmul.f32 2.0, %v2549_v42  ;;  %v1364_v13 = vmul.f32 %v2549_v42, %v1360_v9 }
 0xf3b   :  { %v2133_v48 = vadd.f32 -1.0, %v1353_v43 }
 0xf3c   :  { %v2134_v51 = vadd.f32 -1.0, %v1354_v45 }
 0xf3d   :  { %1367 = vrot.lane.b32.xlu1 %v2133_v48, %s2612_s3 }
 0xf3e   :  { %1369 = vrot.lane.b32.xlu0 %v2134_v51, %s2612_s3 }
 0xf76   :  { %v1261_v53 = vpop.f32.mrf.mxu1 }
 0xf77   :  { %v1267_v55 = vadd.f32 %v1261_v53, %v1216_v52 }
 0xf78   :  { %v2362_v58 = vpop.f32.mrf.mxu1 }
 0xf79   :  { %v2128_v59 = vmul.f32 -1.442695, %v1267_v55 }
 0xf7a   :  { %v1264_v60 = vpop.f32.mrf.mxu1 }
 0xf7b   :  { %2550 = vpow2.f32 %v2128_v59 }
 0xf7c   :  { %v2363_v44 = vpop.f32.mrf.mxu1 }
 0xf88   :  { %v2551_v61 = vpop.eup %2550 }
 0xf89   :  { %v1271_v62 = vadd.f32 1.0, %v2551_v61 }
 0xf8b   :  { %2552 = vrcp.f32 %v1271_v62 }
 0xf98   :  { %v2553_v63 = vpop.eup %2552 }
 0xf99   :  { %v1274_v37 = vmul.f32 2.0, %v2553_v63  ;;  %v1276_v41 = vmul.f32 %v2553_v63, %v2939_v3 }
 0xf9b   :  { %v2129_v8 = vadd.f32 -1.0, %v1274_v37 }
 0xf9d   :  { %1278 = vrot.lane.b32.xlu1 %v2129_v8, %s2612_s3 }
 0xfaf   :  { %v1368_v1 = vpop.permute.xlu1 %1367 }
 0xfb0   :  { %v1370_v7 = vpop.permute.xlu0 %1369  ;;  %v1373_v2 = vmul.f32 %v2547_v17, %v1368_v1 }
 0xfb1   :  { %v1374_v4 = vmul.f32 %v2549_v42, %v1370_v7 }
 0xfb2   :  { %1377 = vrot.lane.b32.xlu0 %v1373_v2, %s2613_s19 }
 0xfb3   :  { %1379 = vrot.lane.b32.xlu1 %v1374_v4, %s2613_s19 }
0x100f   :  { %v1279_v31 = vpop.permute.xlu1 %1278 }
0x1010   :  { %v1281_v5 = vmul.f32 %v2553_v63, %v1279_v31 }
0x1012   :  { %1283 = vrot.lane.b32.xlu0 %v1281_v5, %s2613_s19 }
0x1024   :  { %v1378_v11 = vpop.permute.xlu0 %1377 }
0x1025   :  { %v2988_v16 = vadd.f32 %v1378_v11, %v1363_v10  ;;  %v1380_v18 = vpop.permute.xlu1 %1379 }
0x1026   :  { %v2990_v56 = vadd.f32 %v1380_v18, %v1364_v13 }
0x1027   :  { %2554 = vtanh.f32 %v2988_v16 }
0x1028   :  { %2556 = vtanh.f32 %v2990_v56 }
0x1034   :  { %v2555_v19 = vpop.eup %2554 }
0x1035   :  { %v2557_v20 = vpop.eup %2556  ;;  %1389 = vrot.lane.b32.xlu1 %v2555_v19, %s2612_s3 }
0x1036   :  { %1391 = vrot.lane.b32.xlu0 %v2557_v20, %s2612_s3 }
0x1084   :  { %v1284_v29 = vpop.permute.xlu0 %1283 }
0x1085   :  { %v2997_v54 = vadd.f32 %v1284_v29, %v1276_v41 }
0x1087   :  { %2558 = vtanh.f32 %v2997_v54 }
0x1094   :  { %v2559_v57 = vpop.eup %2558 }
0x1095   :  { %1289 = vrot.lane.b32.xlu1 %v2559_v57, %s2612_s3 }
0x10a7   :  { %v1390_v21 = vpop.permute.xlu1 %1389 }
0x10a8   :  { %v1392_v24 = vpop.permute.xlu0 %1391  ;;  %v1395_v47 = vmul.f32 %v2547_v17, %v1390_v21 }
0x10a9   :  { %v1396_v25 = vmul.f32 %v2549_v42, %v1392_v24 }
0x10aa   :  { %v1397_v26 = vpack.c.bf16 %v1395_v47, %v1395_v47 }
0x10ab   :  { %v1398_v50 = vpack.c.bf16 %v1396_v25, %v1396_v25 }
0x10ac   :  { %v1401_v27 = vunpack.c.l.b16 %v1397_v26 }
0x10ad   :  { %v1402_v28 = vunpack.c.l.b16 %v1398_v50 }
0x10ae   :  { %v1403_v30 = vrot.slane %v1401_v27, 5 }
0x10af   :  { %v1404_v32 = vrot.slane %v1402_v28, 4 }
0x10b1   :  { %v1405_v3 = vsel %vm233_vm3, %v1404_v32, %v1403_v30  ;;  %v1590_v30 = vrot.slane %v2988_v16, 7  ;;  %v1591_v32 = vrot.slane %v2990_v56, 7 }
0x10b2   :  { %v1406_v33 = vpack.c.b16 %v1405_v3, %v1405_v3 }
0x10b4   :  { %1407 = vrot.lane.b32.xlu0 %v1406_v33, %s2613_s19 }
0x1107   :  { %v1290_v46 = vpop.permute.xlu1 %1289 }
0x1108   :  { %v1292_v34 = vmul.f32 %v2553_v63, %v1290_v46 }
0x110a   :  { %v1293_v35 = vpack.c.bf16 %v1292_v34, %v1292_v34 }
0x110c   :  { %1453 = vrot.lane.b32.xlu1 %v1293_v35, %s2613_s19 }
0x1126   :  { %v1408_v36 = vpop.permute.xlu0 %1407 }
0x1127   :  { %2377 = vmatmul.mubr.msk.bf16.vlgmr.msra.gmra.mxu1 %vm120_vm4, %v1408_v36 }
0x1128   :  { %2389 = vmatpush3.bf16.msra.mxu1 %v2950_v22  ;;  %2392 = vmatprep.mubr.msk.bf16.mxu1 %vm2610_vm1, %v2609_v0 }
0x1129   :  { %2390 = vmatprep.subr.bf16.mxu1 %v2609_v0 }
0x112c   :  { %2391 = vmatpush3.bf16.msra.mxu1 %v2959_v23 }
0x112d   :  { %2404 = vmatprep.subr.bf16.mxu1 %v2609_v0 }
0x112f   :  { %2393 = vmatmul.mubr.msk.bf16.vlgmr.msra.gmra.mxu1 %vm120_vm4, %v1408_v36 }
0x1130   :  { %2405 = vmatpush3.bf16.msra.mxu1 %v3015_v38  ;;  %2408 = vmatprep.mubr.msk.bf16.mxu1 %vm2610_vm1, %v2609_v0 }
0x1131   :  { %2406 = vmatprep.subr.bf16.mxu1 %v2609_v0 }
0x1134   :  { %2407 = vmatpush3.bf16.msra.mxu1 %v3024_v49 }
0x1135   :  { %2420 = vmatprep.subr.bf16.mxu1 %v2609_v0 }
0x117e   :  { %v1454_v39 = vpop.permute.xlu1 %1453 }
0x117f   :  { %2385 = vmatmul.mubr.msk.bf16.vlgmr.msra.gmra.mxu0 %vm120_vm4, %v1454_v39 }
0x1180   :  { %2397 = vmatpush3.bf16.msra.mxu0 %v3032_v40  ;;  %2400 = vmatprep.mubr.msk.bf16.mxu0 %vm2610_vm1, %v2609_v0 }
0x1181   :  { %2398 = vmatprep.subr.bf16.mxu0 %v2609_v0 }
0x1184   :  { %2399 = vmatpush3.bf16.msra.mxu0 %v3041_v15 }
0x1185   :  { %2412 = vmatprep.subr.bf16.mxu0 %v2609_v0 }
0x11e7   :  { %v1446_v17 = vpop.f32.mrf.mxu1 }
0x11e8   :  { %v1447_v9 = vadd.f32 %v3052_v6, %v1446_v17 }
0x11e9   :  { %v2378_v42 = vpop.f32.mrf.mxu1 }
0x11eb   :  { %v1449_v43 = vpop.f32.mrf.mxu1 }
0x11ed   :  { %v2379_v45 = vpop.f32.mrf.mxu1 }
0x11ef   :  { %v1559_v48 = vpop.f32.mrf.mxu1 }
0x11f0   :  { %v1566_v51 = vrot.slane %v1559_v48, 2  ;;  %v1567_v52 = vrot.slane %v1559_v48, 3 }
0x11f1   :  { %v2394_v53 = vpop.f32.mrf.mxu1 }
0x11f2   :  { %v1570_v55 = vadd.f32 %v1566_v51, %v2702_v12  ;;  %v1571_v58 = vadd.f32 %v1567_v52, %v2704_v14 }
0x11f3   :  { %v1562_v59 = vpop.f32.mrf.mxu1 }
0x11f4   :  { %v2140_v60 = vmul.f32 -1.442695, %v1570_v55  ;;  %v2141_v44 = vmul.f32 -1.442695, %v1571_v58 }
0x11f5   :  { %v2395_v61 = vpop.f32.mrf.mxu1 }
0x11f6   :  { %2560 = vpow2.f32 %v2140_v60 }
0x11f7   :  { %2562 = vpow2.f32 %v2141_v44 }
0x1203   :  { %v2561_v62 = vpop.eup %2560 }
0x1204   :  { %v2563_v63 = vpop.eup %2562  ;;  %v1578_v37 = vadd.f32 1.0, %v2561_v62 }
0x1205   :  { %v1579_v8 = vadd.f32 1.0, %v2563_v63 }
0x1206   :  { %2564 = vrcp.f32 %v1578_v37 }
0x1207   :  { %2566 = vrcp.f32 %v1579_v8 }
0x1213   :  { %v2565_v1 = vpop.eup %2564 }
0x1214   :  { %v2567_v7 = vpop.eup %2566  ;;  %v1584_v2 = vmul.f32 2.0, %v2565_v1  ;;  %v1594_v3 = vmul.f32 %v2565_v1, %v1590_v30 }
0x1215   :  { %v1585_v4 = vmul.f32 2.0, %v2567_v7  ;;  %v1595_v46 = vmul.f32 %v2567_v7, %v1591_v32 }
0x1216   :  { %v2142_v31 = vadd.f32 -1.0, %v1584_v2 }
0x1217   :  { %v2143_v5 = vadd.f32 -1.0, %v1585_v4 }
0x1218   :  { %1598 = vrot.lane.b32.xlu0 %v2142_v31, %s2612_s3 }
0x1219   :  { %1600 = vrot.lane.b32.xlu1 %v2143_v5, %s2612_s3 }
0x123f   :  { %v1492_v10 = vpop.f32.mrf.mxu0 }
0x1240   :  { %v1498_v11 = vadd.f32 %v1492_v10, %v1447_v9 }
0x1241   :  { %v2386_v13 = vpop.f32.mrf.mxu0 }
0x1242   :  { %v2137_v18 = vmul.f32 -1.442695, %v1498_v11 }
0x1243   :  { %v1495_v19 = vpop.f32.mrf.mxu0 }
0x1244   :  { %2568 = vpow2.f32 %v2137_v18 }
0x1245   :  { %v2387_v20 = vpop.f32.mrf.mxu0 }
0x1251   :  { %v2569_v41 = vpop.eup %2568 }
0x1252   :  { %v1502_v29 = vadd.f32 1.0, %v2569_v41 }
0x1254   :  { %2570 = vrcp.f32 %v1502_v29 }
0x1261   :  { %v2571_v57 = vpop.eup %2570 }
0x1262   :  { %v1505_v21 = vmul.f32 2.0, %v2571_v57  ;;  %v1507_v16 = vmul.f32 %v2571_v57, %v2997_v54 }
0x1264   :  { %v2138_v24 = vadd.f32 -1.0, %v1505_v21 }
0x1266   :  { %1509 = vrot.lane.b32.xlu0 %v2138_v24, %s2612_s3 }
0x128a   :  { %v1599_v47 = vpop.permute.xlu0 %1598 }
0x128b   :  { %v1604_v25 = vmul.f32 %v2565_v1, %v1599_v47  ;;  %v1601_v26 = vpop.permute.xlu1 %1600 }
0x128c   :  { %v1605_v50 = vmul.f32 %v2567_v7, %v1601_v26 }
0x128d   :  { %1608 = vrot.lane.b32.xlu1 %v1604_v25, %s2613_s19 }
0x128e   :  { %1610 = vrot.lane.b32.xlu0 %v1605_v50, %s2613_s19 }
0x12d8   :  { %v1510_v27 = vpop.permute.xlu0 %1509 }
0x12d9   :  { %v1512_v28 = vmul.f32 %v2571_v57, %v1510_v27 }
0x12db   :  { %1514 = vrot.lane.b32.xlu1 %v1512_v28, %s2613_s19 }
0x12ff   :  { %v1609_v33 = vpop.permute.xlu1 %1608 }
0x1300   :  { %v3061_v34 = vadd.f32 %v1609_v33, %v1594_v3  ;;  %v1611_v35 = vpop.permute.xlu0 %1610 }
0x1301   :  { %v3063_v36 = vadd.f32 %v1611_v35, %v1595_v46 }
0x1302   :  { %2572 = vtanh.f32 %v3061_v34 }
0x1303   :  { %2574 = vtanh.f32 %v3063_v36 }
0x130f   :  { %v2573_v39 = vpop.eup %2572 }
0x1310   :  { %v2575_v17 = vpop.eup %2574  ;;  %1620 = vrot.lane.b32.xlu0 %v2573_v39, %s2612_s3 }
0x1311   :  { %1622 = vrot.lane.b32.xlu1 %v2575_v17, %s2612_s3 }
0x134d   :  { %v1515_v56 = vpop.permute.xlu1 %1514 }
0x134e   :  { %v3070_v42 = vadd.f32 %v1515_v56, %v1507_v16 }
0x1350   :  { %2576 = vtanh.f32 %v3070_v42 }
0x135d   :  { %v2577_v43 = vpop.eup %2576 }
0x135e   :  { %1520 = vrot.lane.b32.xlu0 %v2577_v43, %s2612_s3 }
0x1382   :  { %v1621_v45 = vpop.permute.xlu0 %1620 }
0x1383   :  { %v1623_v48 = vpop.permute.xlu1 %1622  ;;  %v1626_v51 = vmul.f32 %v2565_v1, %v1621_v45  ;;  %v1821_v45 = vrot.slane %v3061_v34, 7 }
0x1384   :  { %v1627_v52 = vmul.f32 %v2567_v7, %v1623_v48  ;;  %v1822_v48 = vrot.slane %v3063_v36, 7 }
0x1385   :  { %v1628_v53 = vpack.c.bf16 %v1626_v51, %v1626_v51 }
0x1386   :  { %v1629_v55 = vpack.c.bf16 %v1627_v52, %v1627_v52 }
0x1387   :  { %v1632_v58 = vunpack.c.l.b16 %v1628_v53 }
0x1388   :  { %v1633_v59 = vunpack.c.l.b16 %v1629_v55 }
0x1389   :  { %v1634_v60 = vrot.slane %v1632_v58, 6 }
0x138a   :  { %v1635_v44 = vrot.slane %v1633_v59, 5 }
0x138c   :  { %v1636_v54 = vsel %vm233_vm3, %v1635_v44, %v1634_v60 }
0x138d   :  { %v1637_v61 = vpack.c.b16 %v1636_v54, %v1636_v54 }
0x138f   :  { %1638 = vrot.lane.b32.xlu1 %v1637_v61, %s2613_s19 }
0x13d0   :  { %v1521_v62 = vpop.permute.xlu0 %1520 }
0x13d1   :  { %v1523_v63 = vmul.f32 %v2571_v57, %v1521_v62 }
0x13d3   :  { %v1524_v37 = vpack.c.bf16 %v1523_v63, %v1523_v63 }
0x13d5   :  { %1684 = vrot.lane.b32.xlu0 %v1524_v37, %s2613_s19 }
0x1401   :  { %v1639_v8 = vpop.permute.xlu1 %1638 }
0x1402   :  { %2401 = vmatmul.mubr.msk.bf16.vlgmr.msra.gmra.mxu0 %vm120_vm4, %v1639_v8 }
0x1403   :  { %2413 = vmatpush3.bf16.msra.mxu0 %v2950_v22  ;;  %2416 = vmatprep.mubr.msk.bf16.mxu0 %vm2610_vm1, %v2609_v0 }
0x1404   :  { %2414 = vmatprep.subr.bf16.mxu0 %v2609_v0 }
0x1407   :  { %2415 = vmatpush3.bf16.msra.mxu0 %v2959_v23 }
0x1408   :  { %2428 = vmatprep.subr.bf16.mxu0 %v2609_v0 }
0x140a   :  { %2417 = vmatmul.mubr.msk.bf16.vlgmr.msra.gmra.mxu0 %vm120_vm4, %v1639_v8 }
0x140b   :  { %2429 = vmatpush3.bf16.msra.mxu0 %v3015_v38  ;;  %2432 = vmatprep.mubr.msk.bf16.mxu0 %vm2610_vm1, %v2609_v0 }
0x140c   :  { %2430 = vmatprep.subr.bf16.mxu0 %v2609_v0 }
0x140f   :  { %2431 = vmatpush3.bf16.msra.mxu0 %v3024_v49 }
0x1447   :  { %v1685_v22 = vpop.permute.xlu0 %1684 }
0x1448   :  { %2409 = vmatmul.mubr.msk.bf16.vlgmr.msra.gmra.mxu1 %vm120_vm4, %v1685_v22 }
0x1449   :  { %2421 = vmatpush3.bf16.msra.mxu1 %v3032_v40  ;;  %2424 = vmatprep.mubr.msk.bf16.mxu1 %vm2610_vm1, %v2609_v0 }
0x144a   :  { %2422 = vmatprep.subr.bf16.mxu1 %v2609_v0 }
0x144d   :  { %2423 = vmatpush3.bf16.msra.mxu1 %v3041_v15 }
0x144e   :  { %2436 = vmatprep.subr.mxu1 %v2609_v0 }
0x14c2   :  { %v1677_v23 = vpop.f32.mrf.mxu0 }
0x14c4   :  { %v2402_v38 = vpop.f32.mrf.mxu0 }
0x14c6   :  { %v1680_v1 = vpop.f32.mrf.mxu0 }
0x14c8   :  { %v2403_v7 = vpop.f32.mrf.mxu0 }
0x14ca   :  { %v1790_v2 = vpop.f32.mrf.mxu0 }
0x14cb   :  { %v1797_v49 = vrot.slane %v1790_v2, 1  ;;  %v1798_v4 = vrot.slane %v1790_v2, 2 }
0x14cc   :  { %v2418_v31 = vpop.f32.mrf.mxu0 }
0x14cd   :  { %v1801_v5 = vadd.f32 %v1797_v49, %v2702_v12  ;;  %v1802_v40 = vadd.f32 %v1798_v4, %v2704_v14  ;;  %v1678_v14 = vadd.f32 %v3052_v6, %v1677_v23 }
0x14ce   :  { %v1793_v9 = vpop.f32.mrf.mxu0 }
0x14cf   :  { %v2149_v10 = vmul.f32 -1.442695, %v1801_v5  ;;  %v2150_v11 = vmul.f32 -1.442695, %v1802_v40 }
0x14d0   :  { %v2419_v13 = vpop.f32.mrf.mxu0 }
0x14d1   :  { %2578 = vpow2.f32 %v2149_v10 }
0x14d2   :  { %2580 = vpow2.f32 %v2150_v11 }
0x14de   :  { %v2579_v15 = vpop.eup %2578 }
0x14df   :  { %v2581_v18 = vpop.eup %2580  ;;  %v1809_v19 = vadd.f32 1.0, %v2579_v15 }
0x14e0   :  { %v1810_v20 = vadd.f32 1.0, %v2581_v18 }
0x14e1   :  { %2582 = vrcp.f32 %v1809_v19 }
0x14e2   :  { %2584 = vrcp.f32 %v1810_v20 }
0x14ee   :  { %v2583_v41 = vpop.eup %2582 }
0x14ef   :  { %v2585_v29 = vpop.eup %2584  ;;  %v1815_v57 = vmul.f32 2.0, %v2583_v41  ;;  %v1825_v51 = vmul.f32 %v2583_v41, %v1821_v45 }
0x14f0   :  { %v1816_v21 = vmul.f32 2.0, %v2585_v29  ;;  %v1826_v53 = vmul.f32 %v2585_v29, %v1822_v48 }
0x14f1   :  { %v2151_v24 = vadd.f32 -1.0, %v1815_v57 }
0x14f2   :  { %v2152_v12 = vadd.f32 -1.0, %v1816_v21 }
0x14f3   :  { %1829 = vrot.lane.b32.xlu1 %v2151_v24, %s2612_s3 }
0x14f4   :  { %1831 = vrot.lane.b32.xlu0 %v2152_v12, %s2612_s3 }
0x1508   :  { %v1723_v47 = vpop.f32.mrf.mxu1 }
0x1509   :  { %v1729_v25 = vadd.f32 %v1723_v47, %v1678_v14 }
0x150a   :  { %v2410_v26 = vpop.f32.mrf.mxu1 }
0x150b   :  { %v2146_v50 = vmul.f32 -1.442695, %v1729_v25 }
0x150c   :  { %v1726_v27 = vpop.f32.mrf.mxu1 }
0x150d   :  { %2586 = vpow2.f32 %v2146_v50 }
0x150e   :  { %v2411_v28 = vpop.f32.mrf.mxu1 }
0x151a   :  { %v2587_v30 = vpop.eup %2586 }
0x151b   :  { %v1733_v32 = vadd.f32 1.0, %v2587_v30  ;;  %v1989_v30 = vld [vmem:[%s3153_s7 + $0x18] sm:$0xff] }
0x151d   :  { %2588 = vrcp.f32 %v1733_v32  ;;  %v1988_v32 = vld [vmem:[%s3153_s7 + $0x10] sm:$0xff] }
0x152a   :  { %v2589_v3 = vpop.eup %2588 }
0x152b   :  { %v1736_v33 = vmul.f32 2.0, %v2589_v3  ;;  %v1738_v54 = vmul.f32 %v2589_v3, %v3070_v42 }
0x152d   :  { %v2147_v46 = vadd.f32 -1.0, %v1736_v33  ;;  %v1986_v33 = vld [vmem:[%s3153_s7] sm:$0xff] }
0x152f   :  { %1740 = vrot.lane.b32.xlu1 %v2147_v46, %s2612_s3 }
0x1565   :  { %v1830_v35 = vpop.permute.xlu1 %1829 }
0x1566   :  { %v1832_v39 = vpop.permute.xlu0 %1831  ;;  %v1835_v17 = vmul.f32 %v2583_v41, %v1830_v35  ;;  %v14_v35 = vstv %s3154_s8 }
0x1567   :  { %v1836_v16 = vmul.f32 %v2585_v29, %v1832_v39  ;;  %15 = vst [vmem:[#allocation2] sm:$0x1] %v14_v35 }
0x1568   :  { %1839 = vrot.lane.b32.xlu0 %v1835_v17, %s2613_s19 }
0x1569   :  { %1841 = vrot.lane.b32.xlu1 %v1836_v16, %s2613_s19 }
0x15a1   :  { %v1741_v56 = vpop.permute.xlu1 %1740 }
0x15a2   :  { %v1743_v43 = vmul.f32 %v2589_v3, %v1741_v56  ;;  %v2157_v56 = vld [vmem:[#allocation2] ss:$0 sm:$0xff] }
0x15a4   :  { %1745 = vrot.lane.b32.xlu0 %v1743_v43, %s2613_s19 }
0x15da   :  { %v1840_v52 = vpop.permute.xlu0 %1839 }
0x15db   :  { %v1845_v55 = vadd.f32 %v1840_v52, %v1825_v51  ;;  %v1842_v58 = vpop.permute.xlu1 %1841 }
0x15dc   :  { %v1846_v59 = vadd.f32 %v1842_v58, %v1826_v53 }
0x15dd   :  { %2590 = vtanh.f32 %v1845_v55 }
0x15de   :  { %2592 = vtanh.f32 %v1846_v59 }
0x15ea   :  { %v2591_v60 = vpop.eup %2590 }
0x15eb   :  { %v2593_v44 = vpop.eup %2592  ;;  %1851 = vrot.lane.b32.xlu1 %v2591_v60, %s2612_s3 }
0x15ec   :  { %1853 = vrot.lane.b32.xlu0 %v2593_v44, %s2612_s3 }
0x1616   :  { %v1746_v61 = vpop.permute.xlu0 %1745 }
0x1617   :  { %v1748_v34 = vadd.f32 %v1746_v61, %v1738_v54 }
0x1619   :  { %2594 = vtanh.f32 %v1748_v34 }
0x1626   :  { %v2595_v36 = vpop.eup %2594 }
0x1627   :  { %1751 = vrot.lane.b32.xlu1 %v2595_v36, %s2612_s3 }
0x165d   :  { %v1852_v62 = vpop.permute.xlu1 %1851 }
0x165e   :  { %v1854_v63 = vpop.permute.xlu0 %1853  ;;  %v1857_v37 = vmul.f32 %v2583_v41, %v1852_v62 }
0x165f   :  { %v1858_v8 = vmul.f32 %v2585_v29, %v1854_v63 }
0x1660   :  { %v1859_v22 = vpack.c.bf16 %v1857_v37, %v1857_v37 }
0x1661   :  { %v1860_v23 = vpack.c.bf16 %v1858_v8, %v1858_v8 }
0x1662   :  { %v1863_v38 = vunpack.c.l.b16 %v1859_v22 }
0x1663   :  { %v1864_v1 = vunpack.c.l.b16 %v1860_v23 }
0x1664   :  { %v1865_v7 = vrot.slane %v1863_v38, 7 }
0x1665   :  { %v1866_v2 = vrot.slane %v1864_v1, 6 }
0x1667   :  { %v1867_v49 = vsel %vm233_vm3, %v1866_v2, %v1865_v7 }
0x1668   :  { %v1868_v4 = vpack.c.b16 %v1867_v49, %v1867_v49 }
0x166a   :  { %1869 = vrot.lane.b32.xlu0 %v1868_v4, %s2613_s19 }
0x1699   :  { %v1752_v42 = vpop.permute.xlu1 %1751 }
0x169a   :  { %v1754_v31 = vmul.f32 %v2589_v3, %v1752_v42  ;;  %v1987_v3 = vld [vmem:[%s3153_s7 + $0x8] sm:$0xff] }
0x169c   :  { %v1755_v5 = vpack.c.bf16 %v1754_v31, %v1754_v31 }
0x169e   :  { %1915 = vrot.lane.b32.xlu1 %v1755_v5, %s2613_s19 }
0x16dc   :  { %v1870_v40 = vpop.permute.xlu0 %1869 }
0x16dd   :  { %2425 = vmatmul.mubr.msk.bf16.vlgmr.msra.gmra.mxu1 %vm120_vm4, %v1870_v40 }
0x16de   :  { %2444 = vmatprep.mubr.msk.f32.mxu1 %vm2610_vm1, %v2609_v0  ;;  %2437 = vmatpush3.msra.mxu1 %v1989_v30 }
0x16df   :  { %2438 = vmatprep.subr.mxu1 %v2609_v0 }
0x16e0   :  { %2439 = vmatpush3.msra.mxu1 %v1988_v32 }
0x16e1   :  { %2440 = vmatprep.subr.mxu1 %v2609_v0 }
0x16e2   :  { %2441 = vmatpush3.msra.mxu1 %v1987_v3 }
0x16e3   :  { %2442 = vmatprep.subr.mxu1 %v2609_v0 }
0x16e4   :  { %2443 = vmatpush3.msra.mxu1 %v1986_v33 }
0x1710   :  { %v1916_v9 = vpop.permute.xlu1 %1915 }
0x1711   :  { %2433 = vmatmul.mubr.msk.bf16.vlgmr.msra.gmra.mxu0 %vm120_vm4, %v1916_v9 }
0x179d   :  { %v1908_v10 = vpop.f32.mrf.mxu1 }
0x179e   :  { %v1909_v18 = vadd.f32 %v3052_v6, %v1908_v10 }
0x179f   :  { %v2426_v11 = vpop.f32.mrf.mxu1 }
0x17a1   :  { %v1911_v13 = vpop.f32.mrf.mxu1 }
0x17a3   :  { %v2427_v15 = vpop.f32.mrf.mxu1 }
0x17d1   :  { %v1954_v19 = vpop.f32.mrf.mxu0 }
0x17d2   :  { %v1960_v20 = vadd.f32 %v1954_v19, %v1909_v18 }
0x17d3   :  { %v2434_v41 = vpop.f32.mrf.mxu0 }
0x17d4   :  { %v2155_v29 = vmul.f32 -1.442695, %v1960_v20 }
0x17d5   :  { %v1957_v57 = vpop.f32.mrf.mxu0 }
0x17d6   :  { %2596 = vpow2.f32 %v2155_v29 }
0x17d7   :  { %v2435_v21 = vpop.f32.mrf.mxu0 }
0x17e3   :  { %v2597_v24 = vpop.eup %2596 }
0x17e4   :  { %v1964_v12 = vadd.f32 1.0, %v2597_v24 }
0x17e6   :  { %2598 = vrcp.f32 %v1964_v12 }
0x17f3   :  { %v2599_v14 = vpop.eup %2598 }
0x17f4   :  { %v1967_v47 = vmul.f32 2.0, %v2599_v14  ;;  %v1969_v6 = vmul.f32 %v2599_v14, %v1748_v34 }
0x17f6   :  { %v2156_v25 = vadd.f32 -1.0, %v1967_v47 }
0x17f8   :  { %1971 = vrot.lane.b32.xlu0 %v2156_v25, %s2612_s3 }
0x186a   :  { %v1972_v26 = vpop.permute.xlu0 %1971 }
0x186b   :  { %v1974_v50 = vmul.f32 %v2599_v14, %v1972_v26 }
0x186d   :  { %1976 = vrot.lane.b32.xlu1 %v1974_v50, %s2613_s19 }
0x18df   :  { %v1977_v27 = vpop.permute.xlu1 %1976 }
0x18e0   :  { %v1979_v28 = vadd.f32 %v1977_v27, %v1969_v6 }
0x18e2   :  { %2600 = vtanh.f32 %v1979_v28 }
0x18ef   :  { %v2601_v46 = vpop.eup %2600 }
0x18f0   :  { %1982 = vrot.lane.b32.xlu0 %v2601_v46, %s2612_s3 }
0x1962   :  { %v1983_v39 = vpop.permute.xlu0 %1982 }
0x1963   :  { %v1985_v17 = vmul.f32 %v2599_v14, %v1983_v39 }
0x1965   :  { %1998 = vrot.lane.b32.xlu1 %v1985_v17, %s2613_s19 }
0x19d7   :  { %v1999_v16 = vpop.permute.xlu1 %1998 }
0x19d8   :  { %2445 = vmatmul.mubr.msk.f32.vlgmr.msra.gmra.mxu1 %vm120_vm4, %v1999_v16 }
0x1a98   :  { %v2068_v43 = vpop.f32.mrf.mxu1 }
0x1a99   :  { %v2069_v0 = vadd.f32 %v2157_v56, %v2068_v43 }
0x1a9a   :  { %v2446_v45 = vpop.f32.mrf.mxu1 }
0x1a9b   :  { %2073 = vst.msk [vmem:[%s3155_s9] sm:$0x3] %vm2072_vm5, %v2069_v0 }

</bundles_post_ra>
